<compile_context>
chip_gen: v5e
topology: v5e:2x2
jax: 0.10.0
libtpu: 0.0.40
codegen_flags: <defaults>
</compile_context>

<pallas_src>
import functools

import jax
import jax.numpy as jnp
from jax.experimental import pallas as pl
from jax.experimental.pallas import tpu as pltpu


def _patcher2d_kernel(x_ref, o_ref, *, patch_size: int, num_tile: int):
    """One block: Tt patch-rows of Bt images -> lane-dense patch slabs.

    x_ref: (Bt, C, Tt, p, W)    NCHW block; C never occupies the minor dim here.
    o_ref: (Bt, Tt, nt*p*p*C)   contiguous output rows (minor width = W*p*C).
    """
    p, nt = patch_size, num_tile
    x = x_ref[...]
    bt, c, tt = x.shape[0], x.shape[1], x.shape[2]

    # (a) Move the small channel axis out of the way with a leading-axes-only
    #     permute: the (sublane, lane) = (ph, W) tiles are untouched, so this is
    #     block renumbering, not an XLU relayout over lane-sparse vregs.
    xc = jnp.transpose(x, (0, 2, 1, 3, 4))                  # (Bt, Tt, C, p, W)

    # (b) Coarse spatial gather (ph, tw, pw) -> (tw, ph, pw), still channel-
    #     major: one static lane slice per patch column, concatenated tw-major
    #     along the ph axis, then a single minor merge to s = nt*p*p lanes.
    chunks = [xc[..., tw * p:(tw + 1) * p] for tw in range(nt)]
    y = jnp.concatenate(chunks, axis=3)                     # (Bt, Tt, C, nt*p, p)
    y = y.reshape(bt, tt, c, nt * p * p)                    # (Bt, Tt, C, s)

    # (c) Single intrinsic fine interleave (channel becomes the fastest dim):
    #     one last-two-dims transpose fused into the lane-dense store.
    z = jnp.transpose(y, (0, 1, 3, 2))                      # (Bt, Tt, s, C)
    o_ref[...] = z.reshape(bt, tt, nt * p * p * c)


def _vmem_capacity_bytes() -> int:
    """Physical VMEM of the current generation (conservative fallback = v7x)."""
    try:
        cap = getattr(pltpu.get_tpu_info(), "vmem_capacity_bytes", None)
        if cap:
            return int(cap)
    except Exception:
        pass
    return 64 << 20


def _choose_tiles(batch: int, nt: int, row_bytes: int, budget_bytes: int):
    """Pick (Bt, Tt): batch elements and patch-rows per grid step."""
    image_bytes = nt * row_bytes
    if image_bytes <= budget_bytes:
        # Whole image(s) per step; block over batch to amortize per-step cost.
        tt = nt
        bt = max(1, min(batch, budget_bytes // image_bytes))
        best_div = max(d for d in range(1, bt + 1) if batch % d == 0)
        if best_div * 2 >= bt:      # prefer an exact divisor unless much smaller
            bt = best_div
    else:
        # Large image: split along patch-rows.  Tt is a multiple of 8 so the
        # output block's sublane dim stays aligned; edge blocks are masked.
        bt = 1
        if nt >= 8:
            tt = min(nt, max(8, (budget_bytes // max(1, row_bytes)) // 8 * 8))
        else:
            tt = nt                 # cannot split further; vmem_limit covers it
    return bt, tt


def patcher2d(x: jax.Array, patch_size: int) -> jax.Array:
    """Pallas equivalent of Patcher2d.forward for NCHW input."""
    B, C, H, W = x.shape
    p = patch_size
    assert H == W, f"Patcher2d requires square inputs, got H={H}, W={W}"
    assert H % p == 0, f"side length {H} not divisible by patch_size {p}"

    nt = H // p
    patch_dims = C * p * p
    row_flat = nt * p * p * C              # output lanes per (image, patch-row)
    itemsize = x.dtype.itemsize
    row_bytes = C * p * W * itemsize       # bytes per (image, patch-row)

    vmem_cap = _vmem_capacity_bytes()
    budget = max(1 << 20, vmem_cap // 16)  # 8 MiB on 128 MiB parts, 4 MiB on v7x
    bt, tt = _choose_tiles(B, nt, row_bytes, budget)

    gb, gt = pl.cdiv(B, bt), pl.cdiv(nt, tt)
    if gb * gt < 2 and B >= 2:
        # Keep both v7x TensorCores busy: force >= 2 parallel grid steps.
        half = max(1, B // 2)
        bt = max(d for d in range(1, half + 1) if B % d == 0)
        gb = pl.cdiv(B, bt)

    # Free metadata reshape; each block DMA is Tt*p*W contiguous elements per
    # (image, channel).
    x5 = x.reshape(B, C, nt, p, W)

    block_bytes = bt * C * tt * p * W * itemsize
    # in + out double-buffered (4 blocks) + ~3 block-sized relayout /
    # intermediate buffers + headroom; clamp to [32 MiB, VMEM - 8 MiB].
    vmem_limit = int(max(32 << 20,
                         min(vmem_cap - (8 << 20),
                             8 * block_bytes + (16 << 20))))

    kernel = functools.partial(_patcher2d_kernel, patch_size=p, num_tile=nt)

    out_rows = pl.pallas_call(
        kernel,
        out_shape=jax.ShapeDtypeStruct((B, nt, row_flat), x.dtype),
        grid=(gb, gt),
        in_specs=[
            # Last two block dims equal the full (p, W) axes -> rule satisfied.
            pl.BlockSpec((bt, C, tt, p, W), lambda b, t: (b, 0, t, 0, 0)),
        ],
        # Lane-dense output rows: minor dim = nt*p*p*C; Tt is nt or a multiple
        # of 8, so the sublane rule is satisfied too.
        out_specs=pl.BlockSpec((bt, tt, row_flat), lambda b, t: (b, t, 0)),
        compiler_params=pltpu.CompilerParams(
            dimension_semantics=("parallel", "parallel"),
            vmem_limit_bytes=vmem_limit,
        ),
        cost_estimate=pl.CostEstimate(
            flops=0,
            transcendentals=0,
            bytes_accessed=2 * B * C * H * W * itemsize,
        ),
    )(x5)

    # Free reshape: (B, nt, nt*p*p*C) has the same memory order as
    # (B, nt*nt, C*p*p).
    return out_rows.reshape(B, nt * nt, patch_dims)


def _reference_patcher2d(x: jax.Array, patch_size: int) -> jax.Array:
    """Pure-JAX transcription of the PyTorch forward (for verification)."""
    B, C, H, W = x.shape
    p = patch_size
    nt = H // p
    patches = x.reshape(B, C, nt, p, nt, p)
    patches = jnp.transpose(patches, (0, 2, 4, 3, 5, 1))
    return patches.reshape(B, nt * nt, C * p * p)


if __name__ == "__main__":
    key = jax.random.PRNGKey(0)
    B, C, H, W = 2, 4, 16, 16
    patch_size = 4

    x = jax.random.normal(key, (B, C, H, W), dtype=jnp.float32)

    out = jax.block_until_ready(patcher2d(x, patch_size))

    ref = _reference_patcher2d(x, patch_size)
    assert out.shape == (B, (H // patch_size) ** 2, C * patch_size ** 2)
    # Pure permutation, dtype-preserving -> exact equality expected.
    assert jnp.array_equal(out, ref), "Pallas output mismatch vs reference"

    print("KERNEL_OK")
</pallas_src>

<mosaic_0001>
module attributes {stable_mosaic.version = 11 : i64} {
  func.func @_patcher2d_kernel(%arg0: i32, %arg1: i32, %arg2: memref<1x4x4x4x16xf32, #tpu.memory_space<vmem>>, %arg3: memref<1x4x256xf32, #tpu.memory_space<vmem>>) attributes {dimension_semantics = [#tpu.dimension_semantics<parallel>, #tpu.dimension_semantics<parallel>], iteration_bounds = array<i64: 2, 1>, scalar_prefetch = 0 : i64, scratch_operands = 0 : i64, tpu.core_type = #tpu.core_type<tc>, window_params = [{transform_indices = @transform_0, window_bounds = array<i64: 1, 4, 4, 4, 16>}, {transform_indices = @transform_1, window_bounds = array<i64: 1, 4, 256>}]} {
    %c0 = arith.constant 0 : index
    %c0_0 = arith.constant 0 : index
    %c0_1 = arith.constant 0 : index
    %c0_2 = arith.constant 0 : index
    %c0_3 = arith.constant 0 : index
    %0 = vector.load %arg2[%c0, %c0_0, %c0_1, %c0_2, %c0_3] : memref<1x4x4x4x16xf32, #tpu.memory_space<vmem>>, vector<1x4x4x4x16xf32>
    %1 = tpu.transpose %0, [0, 2, 1, 3, 4] : vector<1x4x4x4x16xf32> -> vector<1x4x4x4x16xf32>
    %2 = vector.extract_strided_slice %1 {offsets = [0, 0, 0, 0, 0], sizes = [1, 4, 4, 4, 4], strides = [1, 1, 1, 1, 1]} : vector<1x4x4x4x16xf32> to vector<1x4x4x4x4xf32>
    %3 = vector.extract_strided_slice %1 {offsets = [0, 0, 0, 0, 4], sizes = [1, 4, 4, 4, 4], strides = [1, 1, 1, 1, 1]} : vector<1x4x4x4x16xf32> to vector<1x4x4x4x4xf32>
    %4 = vector.extract_strided_slice %1 {offsets = [0, 0, 0, 0, 8], sizes = [1, 4, 4, 4, 4], strides = [1, 1, 1, 1, 1]} : vector<1x4x4x4x16xf32> to vector<1x4x4x4x4xf32>
    %5 = vector.extract_strided_slice %1 {offsets = [0, 0, 0, 0, 12], sizes = [1, 4, 4, 4, 4], strides = [1, 1, 1, 1, 1]} : vector<1x4x4x4x16xf32> to vector<1x4x4x4x4xf32>
    %6 = tpu.concatenate %2, %3, %4, %5 in 3 : vector<1x4x4x4x4xf32>, vector<1x4x4x4x4xf32>, vector<1x4x4x4x4xf32>, vector<1x4x4x4x4xf32> -> vector<1x4x4x16x4xf32>
    %7 = vector.shape_cast %6 : vector<1x4x4x16x4xf32> to vector<1x4x4x64xf32>
    %8 = tpu.transpose %7, [0, 1, 3, 2] : vector<1x4x4x64xf32> -> vector<1x4x64x4xf32>
    %9 = vector.shape_cast %8 : vector<1x4x64x4xf32> to vector<1x4x256xf32>
    %c0_4 = arith.constant 0 : index
    %c0_5 = arith.constant 0 : index
    %c0_6 = arith.constant 0 : index
    %10 = vector.load %arg3[%c0_4, %c0_5, %c0_6] : memref<1x4x256xf32, #tpu.memory_space<vmem>>, vector<1x4x256xf32>
    tpu.vector_store %arg3[%c0_4, %c0_5, %c0_6], %9 {strides = array<i32>} : memref<1x4x256xf32, #tpu.memory_space<vmem>>, vector<1x4x256xf32>,
    return
  }
  func.func @transform_0(%arg0: i32, %arg1: i32) -> (i32, i32, i32, i32, i32) {
    %c0_i32 = arith.constant 0 : i32
    %c0_i32_0 = arith.constant 0 : i32
    %c0_i32_1 = arith.constant 0 : i32
    %c0_i32_2 = arith.constant 0 : i32
    return %arg0, %c0_i32, %arg1, %c0_i32_0, %c0_i32_1 : i32, i32, i32, i32, i32
  }
  func.func @transform_1(%arg0: i32, %arg1: i32) -> (i32, i32, i32) {
    %c0_i32 = arith.constant 0 : i32
    %c0_i32_0 = arith.constant 0 : i32
    return %arg0, %arg1, %c0_i32 : i32, i32, i32
  }
}

</mosaic_0001>

<bundles_post_ra>
// kernel: tpu_custom_call.1
= control target key start
LH: loop header
LB: loop body
LE: loop exit
PB: predicated region body
PF: predicated region fallthrough
CT: control target
= control target key end

     0   :  { %6 = vsyncpa [#allocation3], 0  ;;  %s3775_s0 = inlined_call_operand.hbm [shape: f32[2,4,4,4,16], index: 0, kind: input, shape index: {}]   ;;  %s3776_s1 = inlined_call_operand.hbm [shape: f32[2,4,256], index: 1, kind: output, shape index: {}]  }
   0x1   :  { %8 = vsyncpa [#allocation3 + $0x1], 0 }
   0x2   :  { %9 = vsyncpa [#allocation4], 0 }
   0x3   :  { %11 = vsyncpa [#allocation4 + $0x1], 0  ;;  %s2430_s6 = smov 0   ;;  %s2432_s7 = smov 0  }
   0x4   :  { %s2434_s8 = smov 0   ;;  %s2436_s9 = smov 0  }
   0x5   :  { %s2438_s10 = smov 0   ;;  %s2440_s11 = smov 0  }
   0x6 LB: > { %s2156_s12 = sadd.s32 4294967295, %s2383_s11   ;;  %s2157_s13 = sadd.s32 4294967294, %s2383_s11   ;;  %s2383_s11 = sphi %s2440_s11, %s17_s11   ;;  %s2379_s10 = sphi %s2438_s10, %s3833_s10   ;;  %s2375_s9 = sphi %s2436_s9, %s3832_s9   ;;  %s2371_s8 = sphi %s2434_s8, %s3831_s8   ;;  %s2367_s7 = sphi %s2432_s7, %s3830_s7   ;;  %s2363_s6 = sphi %s2430_s6, %s3829_s6  }
   0x7   : > { %s29_s14 = sadd.s32 1, %s2379_s10  ;;  %s38_s15 = sadd.s32 1, %s2371_s8 }
   0x8   : > { %p31_p0 = scmp.ge.s32.totalorder %s29_s14, 2  ;;  %p45_p1 = scmp.ne.s32.totalorder %s2371_s8, %s2367_s7 }
   0x9   : > { %p46_p2 = scmp.eq.s32.totalorder %s2383_s11, 0  ;;  %p51_p3 = scmp.ne.s32.totalorder %s2367_s7, %s2363_s6 }
   0xa   : > { %s3835_s14 = smov (%p31_p0, %s29_s14), 0  ;;  %p52_p5 = scmp.eq.s32.totalorder %s2156_s12, 0 }
   0xb   : > { %p2471_p4 = por %p46_p2, %p45_p1  ;;  %s33_s17 = ssub.s32 %s2379_s10, %s3835_s14 }
   0xc   : > { %p77_p6 = scmp.eq.s32.totalorder %s2156_s12, 1  ;;  %p36_p7 = scmp.eq.s32.totalorder %s33_s17, 0 }
   0xd   : > { %p2477_p8 = por %p52_p5, %p51_p3  ;;  %p83_p10 = scmp.eq.s32.totalorder %s2157_s13, 1 }
   0xe   : > { %p2481_p9 = por %p77_p6, %p45_p1  ;;  %p2159_p12 = scmp.ge.s32.totalorder %s2383_s11, 2 }
   0xf   : > { %s2486_s20 = scalar_select %p36_p7, %s2371_s8, %s38_s15  }
  0x10   : > { %p2488_p11 = por %p83_p10, %p51_p3  ;;  %p2185_p13 = scmp.lt.s32.totalorder %s2383_s11, 2 }
  0x11   : > { %s103_s22 = sand.u32 1, %s2371_s8   ;;  %s2171_s24 = sshll.u32 %s2379_s10, 6 }
  0x12   : > { %s2160_s23 = sshll.u32 %s103_s22, 6  ;;  %s114_s27 = scalar_lea.hbm %s3775_s0, %s2171_s24 }
  0x13   : > { %s107_s28 = scalar_lea.vmem [#allocation2], %s2160_s23  ;;  %s115_s30 = sshll.u32 %s114_s27, 4  ;;  %s116_s30 = int_to_ptr.hbm [resolvable:$true] %s115_s30 }
  0x14   : > { %s117_s29 = sshll.u32 %s107_s28, 4  ;;  %p2178_p0 = pnand %p2185_p13, %p2471_p4  ;;  %s118_s29 = int_to_ptr.vmem [resolvable:$true] %s117_s29 }
  0x15   : > { %p2163_p1 = scmp.ge.s32.totalorder %s2383_s11, 1  ;;  %s104_s2 = scalar_lea.sflag [#allocation3], %s103_s22 }
  0x16   : > { %s2385_s3 = smov 64   ;;  %s2386_s4 = smov 4  }
  0x17   : > { %2180 = dma.hbm_to_vmem [thread:$0]  (!%p2178_p0), %s116_s30, 1024, %s118_s29, %s104_s2, %s2385_s3, %s2385_s3, %s2386_s4  }
  0x18   : > { %p125_p2 = scmp.lt.s32.totalorder %s2383_s11, 3 }
  0x1a   : > { %p126_p3 = pnand %p2163_p1, %p125_p2 }
  0x1b   : > { %s2504_s5 = sand.u32 (!%p126_p3), 1, %s2367_s7  }
  0x1c   : > { %129 = sbr.rel (%p126_p3) target bundleno = 1469 (0x5bd), region = 24  ;;  %s2164_s12 = sshll.u32 (!%p126_p3), %s2504_s5, 6 }
  0x1d   : > { %s132_s13 = scalar_lea.sflag (!%p126_p3), [#allocation3], %s2504_s5  ;;  %s2508_s15 = scalar_lea.vmem (!%p126_p3), [#allocation2], %s2164_s12 }
  0x21   : > { %2354 = dma.done.wait (%p2477_p8), %s132_s13, 1024  }
  0x22   : > { %2356 = vsyncadd (%p2477_p8), %s132_s13, 4294966272  ;;  %v2515_v0 = vld [vmem:[%s2508_s15 + $0x20] sm:$0xf]  ;;  %v2518_v1 = vld [vmem:[%s2508_s15 + $0x4] sm:$0xf]  ;;  %s3781_s16 = smov 124  }
  0x23   : > { %v2521_v2 = vld [vmem:[%s2508_s15] sm:$0xf]  ;;  %v190_v3 = vrot.slane %v2515_v0, 4  ;;  %v192_v4 = vrot.slane %v2518_v1, 4  ;;  %v2534_v6 = vld [vmem:[%s2508_s15 + $0x30] sm:$0xf] }
  0x24   : > { %v188_v5 = vrot.slane %v2521_v2, 4  ;;  %v2537_v7 = vld [vmem:[%s2508_s15 + $0x14] sm:$0xf]  ;;  %v2540_v8 = vld [vmem:[%s2508_s15 + $0x10] sm:$0xf]  ;;  %v191_v9 = vrot.slane %v2534_v6, 4 }
  0x25   : > { %208 = vrot.lane.b32.xlu1 %v190_v3, %s3781_s16  ;;  %212 = vrot.lane.b32.xlu2 %v192_v4, %s3781_s16  ;;  %v193_v10 = vrot.slane %v2537_v7, 4  ;;  %v189_v11 = vrot.slane %v2540_v8, 4  ;;  %v2549_v12 = vld [vmem:[%s2508_s15 + $0x34] sm:$0xf]  ;;  %v2552_v13 = vld [vmem:[%s2508_s15 + $0x8] sm:$0xf] }
  0x26   : > { %204 = vrot.lane.b32.xlu0 %v188_v5, %s3781_s16  ;;  %v2555_v14 = vld [vmem:[%s2508_s15 + $0x24] sm:$0xf]  ;;  %v195_v15 = vrot.slane %v2549_v12, 4  ;;  %v196_v16 = vrot.slane %v2552_v13, 4  ;;  %v2564_v18 = vld [vmem:[%s2508_s15 + $0x28] sm:$0xf] }
  0x27   : > { %v194_v17 = vrot.slane %v2555_v14, 4  ;;  %v2567_v19 = vld [vmem:[%s2508_s15 + $0x38] sm:$0xf]  ;;  %v198_v21 = vrot.slane %v2564_v18, 4  ;;  %v2579_v24 = vld [vmem:[%s2508_s15 + $0x1c] sm:$0xf] }
  0x28   : > { %v2570_v20 = vld [vmem:[%s2508_s15 + $0x18] sm:$0xf]  ;;  %v199_v22 = vrot.slane %v2567_v19, 4  ;;  %v2582_v25 = vld [vmem:[%s2508_s15 + $0x2c] sm:$0xf]  ;;  %v201_v27 = vrot.slane %v2579_v24, 4 }
  0x29   : > { %v197_v23 = vrot.slane %v2570_v20, 4  ;;  %v2585_v26 = vld [vmem:[%s2508_s15 + $0xc] sm:$0xf]  ;;  %v202_v28 = vrot.slane %v2582_v25, 4  ;;  %v2594_v30 = vld [vmem:[%s2508_s15 + $0x3c] sm:$0xf] }
  0x2a   : > { %v200_v29 = vrot.slane %v2585_v26, 4  ;;  %v203_v31 = vrot.slane %v2594_v30, 4  ;;  %s2388_s17 = smov 120   ;;  %s2389_s18 = smov 116   ;;  %vm3777_vm0 = vcmask 1043456   ;;  %vm382_vm1 = vcmask 1047556  }
  0x2b   : > { %v2390_v38 = vmov 1983009808   ;;  %v2391_v47 = vmov 1934713408   ;;  %s2392_s22 = smov 8   ;;  %s2393_s23 = smov 4  }
  0x2c   : > { %v387_v39 = vunpack.c.l.s4 %v2390_v38  ;;  %v411_v48 = vunpack.c.l.s4 %v2391_v47  ;;  %s2394_s24 = smov 12   ;;  %s3778_s25 = smov 16   ;;  %vm1070_vm2 = vcmask 31744   ;;  %vm1075_vm3 = vcmask 64512  }
  0x2d   : > { %210 = vrot.lane.b32.xlu1 %v191_v9, %s3781_s16  ;;  %214 = vrot.lane.b32.xlu2 %v193_v10, %s3781_s16  ;;  %s2396_s26 = smov 20   ;;  %s2397_s27 = smov 24   ;;  %vm1085_vm4 = vcmask 130048   ;;  %vm1080_vm5 = vcmask 97280   ;;  %vm1090_vm6 = vcmask 162816   ;;  %vm1095_vm7 = vcmask 195584  }
  0x2e   : > { %206 = vrot.lane.b32.xlu0 %v189_v11, %s3781_s16  ;;  %v2654_v42 = vunpack.c.0.s8 %v387_v39  ;;  %v2677_v55 = vunpack.c.0.s8 %v411_v48  ;;  %s2398_s28 = smov 28   ;;  %s2399_s29 = smov 32   ;;  %vm1100_vm8 = vcmask 228352   ;;  %vm1105_vm9 = vcmask 261120  }
  0x2f   : > { %s2400_s30 = smov 36   ;;  %s2401_s2 = smov 40   ;;  %vm3796_vm10 = vcmask 293888   ;;  %vm3795_vm11 = vcmask 326656   ;;  %vm3792_vm12 = vcmask 359424   ;;  %vm3789_vm13 = vcmask 392192  }
  0x30   : > { %s2402_s3 = smov 44   ;;  %s2403_s4 = smov 48   ;;  %vm3786_vm14 = vcmask 424960   ;;  %vm3788_vm15 = vcmask 490496  }
  0x31   : > { %s2404_s12 = smov 52   ;;  %s2405_s13 = smov 56  }
  0x32   : > { %s2406_s15 = smov 60  }
  0x35   : > { %218 = vrot.lane.b32.xlu1 %v195_v15, %s3781_s16  ;;  %220 = vrot.lane.b32.xlu2 %v196_v16, %s3781_s16 }
  0x36   : > { %216 = vrot.lane.b32.xlu0 %v194_v17, %s3781_s16 }
  0x3d   : > { %224 = vrot.lane.b32.xlu1 %v198_v21, %s3781_s16  ;;  %226 = vrot.lane.b32.xlu2 %v199_v22, %s3781_s16 }
  0x3e   : > { %222 = vrot.lane.b32.xlu0 %v197_v23, %s3781_s16 }
  0x45   : > { %230 = vrot.lane.b32.xlu1 %v201_v27, %s3781_s16  ;;  %232 = vrot.lane.b32.xlu2 %v202_v28, %s3781_s16 }
  0x46   : > { %228 = vrot.lane.b32.xlu0 %v200_v29, %s3781_s16 }
  0x4d   : > { %254 = vrot.lane.b32.xlu2 %v2540_v8, %s2388_s17  ;;  %252 = vrot.lane.b32.xlu1 %v2521_v2, %s2388_s17 }
  0x4e   : > { %234 = vrot.lane.b32.xlu0 %v203_v31, %s3781_s16 }
  0x55   : > { %260 = vrot.lane.b32.xlu2 %v2518_v1, %s2388_s17  ;;  %258 = vrot.lane.b32.xlu1 %v2534_v6, %s2388_s17 }
  0x56   : > { %256 = vrot.lane.b32.xlu0 %v2515_v0, %s2388_s17 }
  0x5d   : > { %266 = vrot.lane.b32.xlu2 %v2549_v12, %s2388_s17  ;;  %264 = vrot.lane.b32.xlu1 %v2555_v14, %s2388_s17 }
  0x5e   : > { %262 = vrot.lane.b32.xlu0 %v2537_v7, %s2388_s17 }
  0x65   : > { %272 = vrot.lane.b32.xlu2 %v2564_v18, %s2388_s17  ;;  %270 = vrot.lane.b32.xlu1 %v2570_v20, %s2388_s17 }
  0x66   : > { %268 = vrot.lane.b32.xlu0 %v2552_v13, %s2388_s17 }
  0x6d   : > { %278 = vrot.lane.b32.xlu2 %v2579_v24, %s2388_s17  ;;  %276 = vrot.lane.b32.xlu1 %v2585_v26, %s2388_s17 }
  0x6e   : > { %274 = vrot.lane.b32.xlu0 %v2567_v19, %s2388_s17 }
  0x75   : > { %282 = vrot.lane.b32.xlu1 %v2594_v30, %s2388_s17  ;;  %300 = vrot.lane.b32.xlu2 %v188_v5, %s2389_s18 }
  0x76   : > { %280 = vrot.lane.b32.xlu0 %v2582_v25, %s2388_s17 }
  0x7d   : > { %304 = vrot.lane.b32.xlu1 %v190_v3, %s2389_s18  ;;  %306 = vrot.lane.b32.xlu2 %v191_v9, %s2389_s18 }
  0x7e   : > { %302 = vrot.lane.b32.xlu0 %v189_v11, %s2389_s18 }
  0x7f   : > { %v213_v32 = vpop.permute.xlu2 %212 }
  0x80   : > { %v2708_v9 = vsel %vm3777_vm0, %v2518_v1, %v213_v32 }
  0x85   : > { %310 = vrot.lane.b32.xlu1 %v193_v10, %s2389_s18  ;;  %312 = vrot.lane.b32.xlu2 %v194_v17, %s2389_s18 }
  0x86   : > { %308 = vrot.lane.b32.xlu0 %v192_v4, %s2389_s18 }
  0x87   : > { %v215_v33 = vpop.permute.xlu2 %214 }
  0x8d   : > { %316 = vrot.lane.b32.xlu1 %v196_v16, %s2389_s18  ;;  %318 = vrot.lane.b32.xlu2 %v197_v23, %s2389_s18 }
  0x8e   : > { %314 = vrot.lane.b32.xlu0 %v195_v15, %s2389_s18 }
  0x8f   : > { %v2644_v34 = vpop.permute.xlu2 %220 }
  0x95   : > { %322 = vrot.lane.b32.xlu1 %v199_v22, %s2389_s18  ;;  %324 = vrot.lane.b32.xlu2 %v200_v29, %s2389_s18 }
  0x96   : > { %320 = vrot.lane.b32.xlu0 %v198_v21, %s2389_s18 }
  0x97   : > { %v209_v35 = vpop.permute.xlu1 %208  ;;  %v227_v36 = vpop.permute.xlu2 %226 }
  0x98   : > { %v2651_v37 = vsel %vm3777_vm0, %v2515_v0, %v209_v35  ;;  %v205_v40 = vpop.permute.xlu0 %204  ;;  %v360_v10 = vsel %vm3777_vm0, %v2567_v19, %v227_v36 }
  0x99   : > { %v381_v41 = vrot.slane %v2651_v37, 4  ;;  %v2658_v43 = vsel %vm3777_vm0, %v2521_v2, %v205_v40  ;;  %v618_v17 = vrot.slane %v360_v10, 4 }
  0x9b   : > { %v383_v44 = vsel %vm382_vm1, %v381_v41, %v2658_v43 }
  0x9c   : > { %v389_v49 = vperm.slane %v383_v44, %v2654_v42 }
  0x9d   : > { %328 = vrot.lane.b32.xlu1 %v202_v28, %s2389_s18  ;;  %330 = vrot.lane.b32.xlu2 %v203_v31, %s2389_s18 }
  0x9e   : > { %326 = vrot.lane.b32.xlu0 %v201_v27, %s2389_s18  ;;  %v408_v56 = vrot.slane %v389_v49, 4 }
  0x9f   : > { %v211_v45 = vpop.permute.xlu1 %210  ;;  %v233_v46 = vpop.permute.xlu2 %232 }
  0xa0   : > { %v2668_v50 = vsel %vm3777_vm0, %v2534_v6, %v211_v45  ;;  %v207_v51 = vpop.permute.xlu0 %206  ;;  %v2703_v6 = vsel %vm3777_vm0, %v2537_v7, %v215_v33  ;;  %v357_v33 = vsel %vm3777_vm0, %v2552_v13, %v2644_v34  ;;  %v2750_v34 = vsel %vm3777_vm0, %v2582_v25, %v233_v46 }
  0xa1   : > { %v394_v52 = vrot.slane %v2668_v50, 4  ;;  %v2673_v53 = vsel %vm3777_vm0, %v2540_v8, %v207_v51 }
  0xa3   : > { %v395_v54 = vsel %vm382_vm1, %v394_v52, %v2673_v53 }
  0xa4   : > { %v401_v57 = vperm.slane %v395_v54, %v2654_v42 }
  0xa6   : > { %v406_v58 = vrot.slane %v401_v57, 4  ;;  %v409_v59 = vsel %vm382_vm1, %v401_v57, %v408_v56 }
  0xa7   : > { %v219_v60 = vpop.permute.xlu1 %218  ;;  %v2681_v61 = vpop.permute.xlu2 %254  ;;  %v2684_v62 = vperm.slane %v409_v59, %v2677_v55 }
  0xa8   : > { %v2688_v63 = vsel %vm3777_vm0, %v2549_v12, %v219_v60  ;;  %v217_v0 = vpop.permute.xlu0 %216  ;;  %v407_v2 = vsel %vm382_vm1, %v406_v58, %v389_v49  ;;  %v718_v49 = vrot.slane %v2750_v34, 4 }
  0xa9   : > { %v506_v3 = vrot.slane %v2688_v63, 4  ;;  %v2694_v4 = vsel %vm3777_vm0, %v2555_v14, %v217_v0  ;;  %850 = vrot.lane.b32.xlu1 %v2684_v62, %s2392_s22  ;;  %v2699_v5 = vperm.slane %v407_v2, %v2677_v55  ;;  %v432_v58 = vrot.slane %v2684_v62, 4 }
  0xaa   : > { %v494_v8 = vrot.slane %v2694_v4, 4 }
  0xab   : > { %v507_v11 = vsel %vm382_vm1, %v506_v3, %v2703_v6  ;;  %v430_v12 = vrot.slane %v2699_v5, 4 }
  0xac   : > { %v513_v14 = vperm.slane %v507_v11, %v2654_v42  ;;  %v495_v7 = vsel %vm382_vm1, %v494_v8, %v2708_v9 }
  0xad   : > { %v501_v15 = vperm.slane %v495_v7, %v2654_v42  ;;  %v431_v16 = vsel %vm382_vm1, 0.0, %v430_v12 }
  0xae   : > { %v518_v1 = vrot.slane %v513_v14, 4  ;;  %834 = vrot.lane.b32.xlu0 %v431_v16, %s2393_s23  ;;  %v396_v16 = vrot.slane %v2673_v53, 4  ;;  %v496_v53 = vrot.slane %v2708_v9, 4 }
  0xaf   : > { %v225_v19 = vpop.permute.xlu1 %224  ;;  %v520_v21 = vrot.slane %v501_v15, 4  ;;  %v2725_v23 = vpop.permute.xlu2 %260 }
  0xb0   : > { %v2723_v22 = vsel %vm3777_vm0, %v2564_v18, %v225_v19  ;;  %v223_v27 = vpop.permute.xlu0 %222  ;;  %v519_v28 = vsel %vm382_vm1, %v518_v1, %v501_v15 }
  0xb1   : > { %v606_v29 = vrot.slane %v2723_v22, 4  ;;  %v358_v31 = vsel %vm3777_vm0, %v2570_v20, %v223_v27  ;;  %v521_v32 = vsel %vm382_vm1, %v513_v14, %v520_v21  ;;  %v2742_v39 = vperm.slane %v519_v28, %v2677_v55 }
  0xb2   : > { %v619_v35 = vsel %vm382_vm1, %v618_v17, %v358_v31  ;;  %v2737_v18 = vperm.slane %v521_v32, %v2677_v55  ;;  %v620_v59 = vrot.slane %v358_v31, 4  ;;  %v433_v14 = vsel %vm382_vm1, 0.0, %v432_v58 }
  0xb3   : > { %v607_v36 = vsel %vm382_vm1, %v606_v29, %v357_v33  ;;  %v625_v38 = vperm.slane %v619_v35, %v2654_v42  ;;  %v542_v13 = vrot.slane %v2742_v39, 4 }
  0xb4   : > { %v613_v20 = vperm.slane %v607_v36, %v2654_v42  ;;  %852 = vrot.lane.b32.xlu2 %v2737_v18, %s2392_s22  ;;  %v621_v62 = vsel %vm382_vm1, %v360_v10, %v620_v59  ;;  %v497_v36 = vsel %vm382_vm1, %v2694_v4, %v496_v53 }
  0xb5   : > { %v630_v40 = vrot.slane %v625_v38, 4  ;;  %v543_v41 = vsel %vm382_vm1, 0.0, %v542_v13  ;;  %v2794_v10 = vperm.slane %v621_v62, %v2654_v42 }
  0xb6   : > { %836 = vrot.lane.b32.xlu1 %v543_v41, %s2393_s23  ;;  %v632_v2 = vrot.slane %v613_v20, 4 }
  0xb7   : > { %v231_v44 = vpop.permute.xlu1 %230  ;;  %v631_v45 = vsel %vm382_vm1, %v630_v40, %v613_v20  ;;  %v2759_v51 = vpop.permute.xlu2 %266  ;;  %v642_v9 = vrot.slane %v2794_v10, 4  ;;  %v384_v40 = vrot.slane %v2658_v43, 4 }
  0xb8   : > { %v229_v47 = vpop.permute.xlu0 %228  ;;  %v2756_v48 = vperm.slane %v631_v45, %v2677_v55  ;;  %v362_v8 = vsel %vm3777_vm0, %v2579_v24, %v231_v44  ;;  %v608_v24 = vrot.slane %v357_v33, 4  ;;  %v397_v33 = vsel %vm382_vm1, %v2668_v50, %v396_v16 }
  0xb9   : > { %v2764_v25 = vsel %vm3777_vm0, %v2585_v26, %v229_v47  ;;  %v508_v26 = vrot.slane %v2703_v6, 4  ;;  %v633_v6 = vsel %vm382_vm1, %v625_v38, %v632_v2  ;;  %v405_v50 = vperm.slane %v397_v33, %v2654_v42 }
  0xba   : > { %v654_v52 = vrot.slane %v2756_v48, 4  ;;  %v719_v54 = vsel %vm382_vm1, %v718_v49, %v2764_v25  ;;  %v641_v29 = vperm.slane %v633_v6, %v2677_v55  ;;  %v609_v35 = vsel %vm382_vm1, %v2723_v22, %v608_v24 }
  0xbb   : > { %v725_v60 = vperm.slane %v719_v54, %v2654_v42  ;;  %v617_v22 = vperm.slane %v609_v35, %v2654_v42  ;;  %v2827_v45 = vperm.slane %v497_v36, %v2654_v42  ;;  %v418_v58 = vrot.slane %v405_v50, 4 }
  0xbc   : > { %v655_v46 = vsel %vm382_vm1, 0.0, %v654_v52  ;;  %v656_v41 = vrot.slane %v641_v29, 4  ;;  %v385_v52 = vsel %vm382_vm1, %v2651_v37, %v384_v40  ;;  %v720_v37 = vrot.slane %v2764_v25, 4 }
  0xbd   : > { %838 = vrot.lane.b32.xlu2 %v655_v46, %s2393_s23  ;;  %v744_v7 = vrot.slane %v725_v60, 4  ;;  %v643_v49 = vsel %vm382_vm1, %v642_v9, %v617_v22  ;;  %v732_v46 = vrot.slane %v362_v8, 4  ;;  %v644_v35 = vrot.slane %v617_v22, 4 }
  0xbe   : > { %v657_v54 = vsel %vm382_vm1, 0.0, %v656_v41 }
  0xbf   : > { %v2770_v56 = vpop.permute.xlu1 %252  ;;  %v2779_v11 = vpop.permute.xlu2 %272  ;;  %v645_v41 = vsel %vm382_vm1, %v2794_v10, %v644_v35 }
  0xc0   : > { %v235_v57 = vpop.permute.xlu0 %234 }
  0xc1   : > { %v364_v0 = vsel %vm3777_vm0, %v2594_v30, %v235_v57  ;;  %v509_v30 = vsel %vm382_vm1, %v2688_v63, %v508_v26  ;;  %v393_v26 = vperm.slane %v385_v52, %v2654_v42 }
  0xc2   : > { %v730_v3 = vrot.slane %v364_v0, 4  ;;  %v2800_v28 = vperm.slane %v509_v30, %v2654_v42  ;;  %v733_v59 = vsel %vm382_vm1, %v364_v0, %v732_v46  ;;  %v544_v30 = vrot.slane %v2737_v18, 4 }
  0xc4   : > { %v731_v12 = vsel %vm382_vm1, %v730_v3, %v362_v8  ;;  %v530_v13 = vrot.slane %v2800_v28, 4  ;;  %v741_v3 = vperm.slane %v733_v59, %v2654_v42  ;;  %v419_v8 = vsel %vm382_vm1, %v418_v58, %v393_v26 }
  0xc5   : > { %v737_v15 = vperm.slane %v731_v12, %v2654_v42  ;;  %866 = vrot.lane.b32.xlu2 %v433_v14, %s2394_s24  ;;  %v425_v25 = vperm.slane %v419_v8, %v2677_v55 }
  0xc6   : > { %v531_v57 = vsel %vm382_vm1, %v530_v13, %v2827_v45 }
  0xc7   : > { %v742_v17 = vrot.slane %v737_v15, 4  ;;  %v2790_v1 = vpop.permute.xlu1 %258  ;;  %v745_v19 = vsel %vm382_vm1, %v737_v15, %v744_v7  ;;  %v2823_v44 = vpop.permute.xlu2 %278  ;;  %v537_v2 = vperm.slane %v531_v57, %v2677_v55  ;;  %v721_v7 = vsel %vm382_vm1, %v2750_v34, %v720_v37 }
  0xc8   : > { %v2796_v21 = vpop.permute.xlu0 %256  ;;  %v753_v27 = vperm.slane %v745_v19, %v2677_v55  ;;  %v754_v15 = vrot.slane %v741_v3, 4  ;;  %v729_v6 = vperm.slane %v721_v7, %v2654_v42  ;;  %v434_v16 = vrot.slane %v425_v25, 4 }
  0xc9   : > { %v743_v63 = vsel %vm382_vm1, %v742_v17, %v725_v60  ;;  %v2843_v60 = vperm.slane %v643_v49, %v2677_v55  ;;  %v546_v62 = vrot.slane %v537_v2, 4  ;;  %v545_v17 = vsel %vm382_vm1, 0.0, %v544_v30 }
  0xca   : > { %856 = vrot.lane.b32.xlu1 %v753_v27, %s2392_s22  ;;  %v768_v31 = vrot.slane %v753_v27, 4  ;;  %v2807_v32 = vperm.slane %v743_v63, %v2677_v55  ;;  %v420_v19 = vrot.slane %v393_v26, 4  ;;  %v755_v34 = vsel %vm382_vm1, %v754_v15, %v729_v6 }
  0xcb   : > { %v547_v24 = vsel %vm382_vm1, 0.0, %v546_v62  ;;  %v761_v53 = vperm.slane %v755_v34, %v2677_v55  ;;  %v653_v49 = vperm.slane %v645_v41, %v2677_v55 }
  0xcc   : > { %v769_v38 = vsel %vm382_vm1, 0.0, %v768_v31  ;;  %v766_v20 = vrot.slane %v2807_v32, 4  ;;  %v421_v18 = vsel %vm382_vm1, %v405_v50, %v420_v19  ;;  %v532_v50 = vrot.slane %v2827_v45, 4 }
  0xcd   : > { %872 = vrot.lane.b32.xlu2 %v769_v38, %s2394_s24  ;;  %v2877_v33 = vperm.slane %v421_v18, %v2677_v55  ;;  %v770_v36 = vrot.slane %v761_v53, 4  ;;  %v756_v38 = vrot.slane %v729_v6, 4  ;;  %v660_v58 = vrot.slane %v653_v49, 4 }
  0xce   : > { %v767_v4 = vsel %vm382_vm1, 0.0, %v766_v20  ;;  %v533_v10 = vsel %vm382_vm1, %v2800_v28, %v532_v50 }
  0xcf   : > { %840 = vrot.lane.b32.xlu0 %v767_v4, %s2393_s23  ;;  %v2830_v47 = vpop.permute.xlu1 %264  ;;  %v301_v12 = vpop.permute.xlu2 %300  ;;  %v757_v40 = vsel %vm382_vm1, %v741_v3, %v756_v38  ;;  %v771_v13 = vsel %vm382_vm1, 0.0, %v770_v36  ;;  %v541_v59 = vperm.slane %v533_v10, %v2677_v55 }
  0xd0   : > { %v2832_v43 = vpop.permute.xlu0 %262  ;;  %v2893_v22 = vperm.slane %v757_v40, %v2677_v55  ;;  %v2923_v37 = vsel %vm3777_vm0, %v2770_v56, %v301_v12 }
  0xd1   : > { %v548_v3 = vrot.slane %v541_v59, 4 }
  0xd2   : > { %870 = vrot.lane.b32.xlu1 %v657_v54, %s2394_s24 }
  0xd3   : > { %v549_v15 = vsel %vm382_vm1, 0.0, %v548_v3 }
  0xd5   : > { %886 = vrot.lane.b32.xlu2 %v2843_v60, %s3778_s25 }
  0xd7   : > { %854 = vrot.lane.b32.xlu0 %v641_v29, %s2392_s22  ;;  %v2853_v0 = vpop.permute.xlu1 %270  ;;  %v435_v29 = vsel %vm382_vm1, 0.0, %v434_v16  ;;  %v307_v31 = vpop.permute.xlu2 %306 }
  0xd8   : > { %v2855_v14 = vpop.permute.xlu0 %268  ;;  %v2898_v52 = vsel %vm3777_vm0, %v2790_v1, %v307_v31 }
  0xd9   : > { %v450_v46 = vrot.slane %v2898_v52, 4 }
  0xda   : > { %884 = vrot.lane.b32.xlu1 %v537_v2, %s3778_s25  ;;  %v658_v2 = vrot.slane %v2843_v60, 4 }
  0xdc   : > { %v659_v7 = vsel %vm382_vm1, 0.0, %v658_v2 }
  0xdd   : > { %900 = vrot.lane.b32.xlu2 %v547_v24, %s2396_s26 }
  0xdf   : > { %868 = vrot.lane.b32.xlu0 %v545_v17, %s2394_s24  ;;  %v2868_v27 = vpop.permute.xlu1 %276  ;;  %v313_v4 = vpop.permute.xlu2 %312 }
  0xe0   : > { %v2870_v63 = vpop.permute.xlu0 %274  ;;  %v2943_v6 = vsel %vm3777_vm0, %v2830_v47, %v313_v4 }
  0xe2   : > { %898 = vrot.lane.b32.xlu1 %v435_v29, %s2396_s26  ;;  %v550_v29 = vrot.slane %v2943_v6, 4 }
  0xe5   : > { %914 = vrot.lane.b32.xlu2 %v2877_v33, %s2397_s27 }
  0xe7   : > { %882 = vrot.lane.b32.xlu0 %v425_v25, %s3778_s25  ;;  %v2882_v20 = vpop.permute.xlu1 %282  ;;  %v319_v8 = vpop.permute.xlu2 %318 }
  0xe8   : > { %v2884_v9 = vpop.permute.xlu0 %280 }
  0xea   : > { %904 = vrot.lane.b32.xlu1 %v771_v13, %s2396_s26 }
  0xed   : > { %920 = vrot.lane.b32.xlu2 %v2893_v22, %s2397_s27 }
  0xef   : > { %888 = vrot.lane.b32.xlu0 %v761_v53, %s3778_s25  ;;  %v305_v45 = vpop.permute.xlu1 %304  ;;  %v325_v16 = vpop.permute.xlu2 %324  ;;  %v436_v53 = vrot.slane %v2877_v33, 4 }
  0xf0   : > { %v2908_v54 = vsel %vm3777_vm0, %v2796_v21, %v305_v45  ;;  %v303_v57 = vpop.permute.xlu0 %302  ;;  %v661_v21 = vsel %vm382_vm1, 0.0, %v660_v58 }
  0xf1   : > { %v2912_v1 = vsel %vm3777_vm0, %v2681_v61, %v303_v57  ;;  %v438_v26 = vrot.slane %v2908_v54, 4  ;;  %v437_v36 = vsel %vm382_vm1, 0.0, %v436_v53 }
  0xf2   : > { %v451_v28 = vsel %vm382_vm1, %v450_v46, %v2912_v1  ;;  %918 = vrot.lane.b32.xlu1 %v653_v49, %s2397_s27  ;;  %v2989_v49 = vsel %vm3777_vm0, %v2853_v0, %v319_v8  ;;  %v772_v46 = vrot.slane %v2893_v22, 4 }
  0xf3   : > { %v2926_v61 = vperm.slane %v451_v28, %v2654_v42  ;;  %v439_v62 = vsel %vm382_vm1, %v438_v26, %v2923_v37 }
  0xf4   : > { %v2934_v56 = vperm.slane %v439_v62, %v2654_v42  ;;  %v773_v26 = vsel %vm382_vm1, 0.0, %v772_v46 }
  0xf5   : > { %934 = vrot.lane.b32.xlu2 %v661_v21, %s2398_s28  ;;  %v462_v12 = vrot.slane %v2926_v61, 4 }
  0xf7   : > { %902 = vrot.lane.b32.xlu0 %v659_v7, %s2396_s26  ;;  %v311_v60 = vpop.permute.xlu1 %310  ;;  %v463_v30 = vsel %vm382_vm1, %v462_v12, %v2934_v56  ;;  %v331_v10 = vpop.permute.xlu2 %330 }
  0xf8   : > { %v309_v25 = vpop.permute.xlu0 %308  ;;  %v469_v19 = vperm.slane %v463_v30, %v2677_v55  ;;  %v2961_v31 = vsel %vm3777_vm0, %v2832_v43, %v311_v60 }
  0xf9   : > { %v2949_v34 = vsel %vm3777_vm0, %v2725_v23, %v309_v25 }
  0xfa   : > { %932 = vrot.lane.b32.xlu1 %v549_v15, %s2398_s28  ;;  %v551_v23 = vsel %vm382_vm1, %v550_v29, %v2949_v34  ;;  %v486_v21 = vrot.slane %v469_v19, 4 }
  0xfb   : > { %v2972_v38 = vperm.slane %v551_v23, %v2654_v42 }
  0xff   : > { %916 = vrot.lane.b32.xlu0 %v541_v59, %s2397_s27  ;;  %v317_v24 = vpop.permute.xlu1 %316  ;;  %v380_v59 = vsel %vm3777_vm0, %v2882_v20, %v331_v10 }
 0x100   : > { %v315_v17 = vpop.permute.xlu0 %314  ;;  %v3000_v58 = vsel %vm3777_vm0, %v2855_v14, %v317_v24  ;;  %v786_v14 = vrot.slane %v380_v59, 4 }
 0x101   : > { %v2953_v18 = vsel %vm3777_vm0, %v2759_v51, %v315_v17  ;;  %v487_v17 = vsel %vm382_vm1, 0.0, %v486_v21  ;;  %v440_v21 = vrot.slane %v2923_v37, 4 }
 0x102   : > { %v562_v47 = vrot.slane %v2953_v18, 4  ;;  %946 = vrot.lane.b32.xlu1 %v469_v19, %s2399_s29 }
 0x104   : > { %v563_v51 = vsel %vm382_vm1, %v562_v47, %v2961_v31 }
 0x105   : > { %v2968_v35 = vperm.slane %v563_v51, %v2654_v42 }
 0x107   : > { %930 = vrot.lane.b32.xlu0 %v437_v36, %s2398_s28  ;;  %v323_v33 = vpop.permute.xlu1 %322  ;;  %v574_v43 = vrot.slane %v2968_v35, 4 }
 0x108   : > { %v2978_v40 = vsel %vm3777_vm0, %v2870_v63, %v323_v33  ;;  %v321_v13 = vpop.permute.xlu0 %320 }
 0x109   : > { %v674_v41 = vrot.slane %v2978_v40, 4  ;;  %v2983_v50 = vsel %vm3777_vm0, %v2779_v11, %v321_v13  ;;  %v575_v4 = vsel %vm382_vm1, %v574_v43, %v2972_v38  ;;  %v377_v11 = vsel %vm3777_vm0, %v2868_v27, %v325_v16 }
 0x10a   : > { %v662_v45 = vrot.slane %v2983_v50, 4  ;;  %v581_v63 = vperm.slane %v575_v4, %v2677_v55  ;;  %v776_v2 = vrot.slane %v377_v11, 4 }
 0x10b   : > { %v675_v57 = vsel %vm382_vm1, %v674_v41, %v2989_v49 }
 0x10c   : > { %v681_v0 = vperm.slane %v675_v57, %v2654_v42  ;;  %948 = vrot.lane.b32.xlu2 %v581_v63, %s2399_s29  ;;  %v663_v22 = vsel %vm382_vm1, %v662_v45, %v3000_v58  ;;  %v598_v13 = vrot.slane %v581_v63, 4  ;;  %v464_v57 = vrot.slane %v2934_v56, 4 }
 0x10d   : > { %v669_v3 = vperm.slane %v663_v22, %v2654_v42  ;;  %v452_v63 = vrot.slane %v2912_v1, 4 }
 0x10e   : > { %v686_v28 = vrot.slane %v681_v0, 4  ;;  %v3021_v24 = vpop.permute.xlu2 %852  ;;  %v599_v46 = vsel %vm382_vm1, 0.0, %v598_v13 }
 0x10f   : > { %936 = vrot.lane.b32.xlu0 %v773_v26, %s2398_s28  ;;  %v329_v27 = vpop.permute.xlu1 %328  ;;  %v688_v4 = vrot.slane %v669_v3, 4 }
 0x110   : > { %v379_v8 = vsel %vm3777_vm0, %v2884_v9, %v329_v27  ;;  %v327_v62 = vpop.permute.xlu0 %326  ;;  %v687_v30 = vsel %vm382_vm1, %v686_v28, %v669_v3  ;;  %v465_v28 = vsel %vm382_vm1, %v2926_v61, %v464_v57  ;;  %v676_v3 = vrot.slane %v2989_v49, 4 }
 0x111   : > { %v774_v7 = vrot.slane %v379_v8, 4  ;;  %v777_v20 = vsel %vm382_vm1, %v379_v8, %v776_v2  ;;  %v378_v60 = vsel %vm3777_vm0, %v2823_v44, %v327_v62  ;;  %v693_v23 = vperm.slane %v687_v30, %v2677_v55 }
 0x112   : > { %v3017_v25 = vperm.slane %v777_v20, %v2654_v42  ;;  %v787_v12 = vsel %vm382_vm1, %v786_v14, %v378_v60  ;;  %v788_v15 = vrot.slane %v378_v60, 4  ;;  %v453_v2 = vsel %vm382_vm1, %v2898_v52, %v452_v63 }
 0x113   : > { %v775_v16 = vsel %vm382_vm1, %v774_v7, %v377_v11  ;;  %v793_v9 = vperm.slane %v787_v12, %v2654_v42  ;;  %v710_v45 = vrot.slane %v693_v23, 4  ;;  %v576_v11 = vrot.slane %v2972_v38, 4 }
 0x114   : > { %v781_v19 = vperm.slane %v775_v16, %v2654_v42  ;;  %v812_v44 = vrot.slane %v3017_v25, 4  ;;  %v789_v29 = vsel %vm382_vm1, %v380_v59, %v788_v15  ;;  %962 = vrot.lane.b32.xlu2 %v487_v17, %s2400_s30  ;;  %v689_v59 = vsel %vm382_vm1, %v681_v0, %v688_v4 }
 0x115   : > { %v3031_v47 = vperm.slane %v789_v29, %v2654_v42  ;;  %v798_v53 = vrot.slane %v793_v9, 4  ;;  %v711_v22 = vsel %vm382_vm1, 0.0, %v710_v45  ;;  %v577_v26 = vsel %vm382_vm1, %v2968_v35, %v576_v11 }
 0x116   : > { %v697_v56 = vperm.slane %v689_v59, %v2677_v55  ;;  %v585_v38 = vperm.slane %v577_v26, %v2677_v55  ;;  %v473_v1 = vperm.slane %v465_v28, %v2677_v55  ;;  %v800_v0 = vrot.slane %v781_v19, 4 }
 0x117   : > { %950 = vrot.lane.b32.xlu0 %v693_v23, %s2399_s29  ;;  %v799_v51 = vsel %vm382_vm1, %v798_v53, %v781_v19  ;;  %v3038_v36 = vsel %vm382_vm1, %v3031_v47, %v812_v44  ;;  %v3043_v10 = vpop.permute.xlu2 %838  ;;  %v3068_v35 = vperm.slane %v453_v2, %v2654_v42  ;;  %v441_v14 = vsel %vm382_vm1, %v2908_v54, %v440_v21 }
 0x118   : > { %v805_v33 = vperm.slane %v799_v51, %v2677_v55  ;;  %v600_v61 = vrot.slane %v585_v38, 4  ;;  %v801_v52 = vsel %vm382_vm1, %v793_v9, %v800_v0  ;;  %v564_v20 = vrot.slane %v2961_v31, 4 }
 0x119   : > { %v474_v7 = vrot.slane %v3068_v35, 4  ;;  %v809_v37 = vperm.slane %v801_v52, %v2677_v55  ;;  %v488_v60 = vrot.slane %v473_v1, 4  ;;  %v449_v12 = vperm.slane %v441_v14, %v2654_v42 }
 0x11a   : > { %952 = vrot.lane.b32.xlu1 %v805_v33, %s2399_s29  ;;  %v822_v43 = vrot.slane %v805_v33, 4  ;;  %v601_v62 = vsel %vm382_vm1, 0.0, %v600_v61  ;;  %v677_v54 = vsel %vm382_vm1, %v2978_v40, %v676_v3  ;;  %v565_v49 = vsel %vm382_vm1, %v2953_v18, %v564_v20 }
 0x11b   : > { %v3076_v8 = vpop.permute.xlu1 %850  ;;  %v475_v15 = vsel %vm382_vm1, %v474_v7, %v449_v12  ;;  %v552_v31 = vrot.slane %v2949_v34, 4  ;;  %v3092_v30 = vperm.slane %v677_v54, %v2654_v42  ;;  %v489_v9 = vsel %vm382_vm1, 0.0, %v488_v60 }
 0x11c   : > { %v823_v41 = vsel %vm382_vm1, 0.0, %v822_v43  ;;  %v664_v17 = vrot.slane %v3000_v58, 4  ;;  %v573_v40 = vperm.slane %v565_v49, %v2654_v42  ;;  %v712_v18 = vrot.slane %v697_v56, 4 }
 0x11d   : > { %968 = vrot.lane.b32.xlu2 %v823_v41, %s2400_s30  ;;  %v481_v19 = vperm.slane %v475_v15, %v2677_v55  ;;  %v810_v29 = vrot.slane %v3031_v47, 4  ;;  %v553_v53 = vsel %vm382_vm1, %v2943_v6, %v552_v31  ;;  %v698_v23 = vrot.slane %v3092_v30, 4 }
 0x11e   : > { %v665_v44 = vsel %vm382_vm1, %v2983_v50, %v664_v17  ;;  %v824_v58 = vrot.slane %v809_v37, 4  ;;  %v586_v51 = vrot.slane %v573_v40, 4  ;;  %v713_v33 = vsel %vm382_vm1, 0.0, %v712_v18 }
 0x11f   : > { %964 = vrot.lane.b32.xlu0 %v599_v46, %s2400_s30  ;;  %v3064_v27 = vpop.permute.xlu2 %866  ;;  %v673_v43 = vperm.slane %v665_v44, %v2654_v42  ;;  %v561_v50 = vperm.slane %v553_v53, %v2654_v42  ;;  %v811_v47 = vsel %vm382_vm1, %v810_v29, %v3017_v25  ;;  %v476_v26 = vrot.slane %v449_v12, 4 }
 0x120   : > { %v835_v13 = vpop.permute.xlu0 %834  ;;  %v825_v6 = vsel %vm382_vm1, 0.0, %v824_v58  ;;  %v817_v46 = vperm.slane %v811_v47, %v2677_v55  ;;  %v1073_v52 = vsel %vm1070_vm2, %v2756_v48, %v3043_v10  ;;  %vm3787_vm0 = vcmask 457728  }
 0x121   : > { %v699_v41 = vsel %vm382_vm1, %v698_v23, %v673_v43  ;;  %v587_v4 = vsel %vm382_vm1, %v586_v51, %v561_v50  ;;  %v588_v0 = vrot.slane %v561_v50, 4  ;;  %v477_v21 = vsel %vm382_vm1, %v3068_v35, %v476_v26 }
 0x122   : > { %966 = vrot.lane.b32.xlu1 %v711_v22, %s2400_s30  ;;  %v705_v11 = vperm.slane %v699_v41, %v2677_v55  ;;  %v593_v25 = vperm.slane %v587_v4, %v2677_v55  ;;  %v490_v22 = vrot.slane %v481_v19, 4  ;;  %v826_v7 = vrot.slane %v817_v46, 4 }
 0x123   : > { %v589_v61 = vsel %vm382_vm1, %v573_v40, %v588_v0  ;;  %v485_v60 = vperm.slane %v477_v21, %v2677_v55  ;;  %v700_v10 = vrot.slane %v673_v43, 4 }
 0x124   : > { %v714_v59 = vrot.slane %v705_v11, 4  ;;  %v602_v2 = vrot.slane %v593_v25, 4  ;;  %v827_v54 = vsel %vm382_vm1, 0.0, %v826_v7 }
 0x125   : > { %982 = vrot.lane.b32.xlu2 %v697_v56, %s2401_s2  ;;  %v492_v15 = vrot.slane %v485_v60, 4  ;;  %v701_v40 = vsel %vm382_vm1, %v3092_v30, %v700_v10 }
 0x126   : > { %v715_v56 = vsel %vm382_vm1, 0.0, %v714_v59  ;;  %v603_v3 = vsel %vm382_vm1, 0.0, %v602_v2 }
 0x127   : > { %978 = vrot.lane.b32.xlu0 %v473_v1, %s2401_s2  ;;  %v3094_v16 = vpop.permute.xlu2 %872  ;;  %v491_v1 = vsel %vm382_vm1, 0.0, %v490_v22  ;;  %v493_v44 = vsel %vm382_vm1, 0.0, %v492_v15 }
 0x128   : > { %v837_v34 = vpop.permute.xlu1 %836 }
 0x129   : > { %v1072_v12 = vsel %vm1070_vm2, %v2742_v39, %v837_v34  ;;  %v1071_v39 = vsel %vm1070_vm2, %v2699_v5, %v835_v13 }
 0x12a   : > { %980 = vrot.lane.b32.xlu1 %v585_v38, %s2401_s2  ;;  %v1077_v31 = vsel %vm1075_vm3, %v1072_v12, %v3021_v24  ;;  %v3161_v24 = vperm.slane %v701_v40, %v2677_v55  ;;  %v1076_v29 = vsel %vm1075_vm3, %v1071_v39, %v3076_v8 }
 0x12b   : > { %v1081_v30 = vsel %vm1080_vm5, %v1076_v29, %v3064_v27 }
 0x12d   : > { %996 = vrot.lane.b32.xlu2 %v601_v62, %s2402_s3 }
 0x12f   : > { %984 = vrot.lane.b32.xlu0 %v809_v37, %s2401_s2  ;;  %v887_v45 = vpop.permute.xlu2 %886  ;;  %v597_v37 = vperm.slane %v589_v61, %v2677_v55 }
 0x131   : > { %v604_v58 = vrot.slane %v597_v37, 4 }
 0x132   : > { %994 = vrot.lane.b32.xlu1 %v489_v9, %s2402_s3 }
 0x133   : > { %v605_v47 = vsel %vm382_vm1, 0.0, %v604_v58 }
 0x135   : > { %1010 = vrot.lane.b32.xlu2 %v481_v19, %s2403_s4 }
 0x137   : > { %998 = vrot.lane.b32.xlu0 %v713_v33, %s2402_s3  ;;  %v901_v38 = vpop.permute.xlu2 %900 }
 0x13a   : > { %1000 = vrot.lane.b32.xlu1 %v825_v6, %s2402_s3 }
 0x13c   : > { %v3119_v57 = vpop.permute.xlu1 %856 }
 0x13d   : > { %1016 = vrot.lane.b32.xlu2 %v817_v46, %s2403_s4 }
 0x13f   : > { %1012 = vrot.lane.b32.xlu0 %v593_v25, %s2403_s4  ;;  %v915_v49 = vpop.permute.xlu2 %914 }
 0x141   : > { %v841_v63 = vpop.permute.xlu0 %840 }
 0x142   : > { %1014 = vrot.lane.b32.xlu1 %v705_v11, %s2403_s4  ;;  %v1074_v51 = vsel %vm1070_vm2, %v2807_v32, %v841_v63 }
 0x143   : > { %v1079_v8 = vsel %vm1075_vm3, %v1074_v51, %v3119_v57 }
 0x144   : > { %v871_v28 = vpop.permute.xlu1 %870  ;;  %v1084_v27 = vsel %vm1080_vm5, %v1079_v8, %v3094_v16 }
 0x145   : > { %1030 = vrot.lane.b32.xlu2 %v715_v56, %s2404_s12 }
 0x147   : > { %1026 = vrot.lane.b32.xlu0 %v491_v1, %s2404_s12  ;;  %v921_v5 = vpop.permute.xlu2 %920 }
 0x149   : > { %v855_v14 = vpop.permute.xlu0 %854 }
 0x14a   : > { %v1078_v62 = vsel %vm1075_vm3, %v1073_v52, %v855_v14  ;;  %1028 = vrot.lane.b32.xlu1 %v603_v3, %s2404_s12 }
 0x14b   : > { %v1083_v20 = vsel %vm1080_vm5, %v1078_v62, %v871_v28 }
 0x14c   : > { %v885_v35 = vpop.permute.xlu1 %884  ;;  %v1088_v48 = vsel %vm1085_vm4, %v1083_v20, %v887_v45 }
 0x14d   : > { %1044 = vrot.lane.b32.xlu2 %v597_v37, %s2405_s13 }
 0x14f   : > { %1032 = vrot.lane.b32.xlu0 %v827_v54, %s2404_s12  ;;  %v935_v41 = vpop.permute.xlu2 %934 }
 0x151   : > { %v869_v9 = vpop.permute.xlu0 %868 }
 0x152   : > { %v1082_v17 = vsel %vm1080_vm5, %v1077_v31, %v869_v9  ;;  %1042 = vrot.lane.b32.xlu1 %v485_v60, %s2405_s13 }
 0x153   : > { %v1087_v18 = vsel %vm1085_vm4, %v1082_v17, %v885_v35 }
 0x154   : > { %v899_v19 = vpop.permute.xlu1 %898  ;;  %v1092_v34 = vsel %vm1090_vm6, %v1087_v18, %v901_v38 }
 0x155   : > { %1058 = vrot.lane.b32.xlu2 %v493_v44, %s2406_s15 }
 0x157   : > { %1046 = vrot.lane.b32.xlu0 %v3161_v24, %s2405_s13 }
 0x159   : > { %v883_v53 = vpop.permute.xlu0 %882 }
 0x15a   : > { %v1086_v23 = vsel %vm1085_vm4, %v1081_v30, %v883_v53 }
 0x15b   : > { %v1091_v33 = vsel %vm1090_vm6, %v1086_v23, %v899_v19 }
 0x15c   : > { %v1096_v43 = vsel %vm1095_vm7, %v1091_v33, %v915_v49  ;;  %v905_v50 = vpop.permute.xlu1 %904 }
 0x15f   : > { %1060 = vrot.lane.b32.xlu0 %v605_v47, %s2406_s15 }
 0x161   : > { %v889_v13 = vpop.permute.xlu0 %888 }
 0x162   : > { %v1089_v6 = vsel %vm1085_vm4, %v1084_v27, %v889_v13 }
 0x163   : > { %v1094_v32 = vsel %vm1090_vm6, %v1089_v6, %v905_v50 }
 0x164   : > { %v1099_v4 = vsel %vm1095_vm7, %v1094_v32, %v921_v5  ;;  %v919_v45 = vpop.permute.xlu1 %918 }
 0x166   : > { %v949_v11 = vpop.permute.xlu2 %948 }
 0x169   : > { %v903_v46 = vpop.permute.xlu0 %902 }
 0x16a   : > { %v1093_v57 = vsel %vm1090_vm6, %v1088_v48, %v903_v46 }
 0x16b   : > { %v1098_v25 = vsel %vm1095_vm7, %v1093_v57, %v919_v45 }
 0x16c   : > { %v1103_v59 = vsel %vm1100_vm8, %v1098_v25, %v935_v41  ;;  %v933_v16 = vpop.permute.xlu1 %932 }
 0x16e   : > { %v963_v56 = vpop.permute.xlu2 %962 }
 0x171   : > { %v917_v63 = vpop.permute.xlu0 %916 }
 0x172   : > { %v1097_v22 = vsel %vm1095_vm7, %v1092_v34, %v917_v63 }
 0x173   : > { %v1102_v26 = vsel %vm1100_vm8, %v1097_v22, %v933_v16 }
 0x174   : > { %v1107_v28 = vsel %vm1105_vm9, %v1102_v26, %v949_v11  ;;  %v947_v21 = vpop.permute.xlu1 %946 }
 0x177   : > { %v969_v1 = vpop.permute.xlu2 %968 }
 0x179   : > { %v931_v38 = vpop.permute.xlu0 %930 }
 0x17a   : > { %v1101_v2 = vsel %vm1100_vm8, %v1096_v43, %v931_v38  ;;  %v716_v38 = vrot.slane %v3161_v24, 4 }
 0x17b   : > { %v1106_v58 = vsel %vm1105_vm9, %v1101_v2, %v947_v21 }
 0x17c   : > { %v1111_v43 = vsel %vm3796_vm10, %v1106_v58, %v963_v56  ;;  %v717_v2 = vsel %vm382_vm1, 0.0, %v716_v38 }
 0x17f   : > { %v983_v52 = vpop.permute.xlu2 %982 }
 0x181   : > { %v937_v0 = vpop.permute.xlu0 %936 }
 0x182   : > { %v1104_v61 = vsel %vm1100_vm8, %v1099_v4, %v937_v0 }
 0x187   : > { %v997_v35 = vpop.permute.xlu2 %996 }
 0x189   : > { %v951_v14 = vpop.permute.xlu0 %950 }
 0x18a   : > { %v1108_v3 = vsel %vm1105_vm9, %v1103_v59, %v951_v14 }
 0x18c   : > { %v953_v62 = vpop.permute.xlu1 %952 }
 0x18d   : > { %v1109_v7 = vsel %vm1105_vm9, %v1104_v61, %v953_v62 }
 0x18e   : > { %v1114_v20 = vsel %vm3796_vm10, %v1109_v7, %v969_v1 }
 0x18f   : > { %v1011_v49 = vpop.permute.xlu2 %1010 }
 0x191   : > { %v965_v37 = vpop.permute.xlu0 %964 }
 0x192   : > { %v1112_v46 = vsel %vm3796_vm10, %v1107_v28, %v965_v37  ;;  %v821_v28 = vperm.slane %v3038_v36, %v2677_v55 }
 0x194   : > { %v967_v60 = vpop.permute.xlu1 %966 }
 0x195   : > { %v1113_v48 = vsel %vm3796_vm10, %v1108_v3, %v967_v60 }
 0x196   : > { %v1118_v10 = vsel %vm3795_vm11, %v1113_v48, %v983_v52 }
 0x197   : > { %v1017_v17 = vpop.permute.xlu2 %1016 }
 0x199   : > { %v979_v12 = vpop.permute.xlu0 %978 }
 0x19a   : > { %v1116_v8 = vsel %vm3795_vm11, %v1111_v43, %v979_v12 }
 0x19c   : > { %v981_v54 = vpop.permute.xlu1 %980 }
 0x19d   : > { %v1117_v57 = vsel %vm3795_vm11, %v1112_v46, %v981_v54 }
 0x19e   : > { %v1122_v59 = vsel %vm3792_vm12, %v1117_v57, %v997_v35 }
 0x19f   : > { %v1031_v34 = vpop.permute.xlu2 %1030 }
 0x1a1   : > { %v985_v15 = vpop.permute.xlu0 %984 }
 0x1a2   : > { %v1119_v31 = vsel %vm3795_vm11, %v1114_v20, %v985_v15 }
 0x1a4   : > { %v995_v9 = vpop.permute.xlu1 %994 }
 0x1a5   : > { %v1121_v50 = vsel %vm3792_vm12, %v1116_v8, %v995_v9 }
 0x1a6   : > { %v1126_v13 = vsel %vm3789_vm13, %v1121_v50, %v1011_v49  ;;  %v828_v49 = vrot.slane %v821_v28, 4 }
 0x1a7   : > { %v1045_v51 = vpop.permute.xlu2 %1044 }
 0x1a8   : > { %v829_v9 = vsel %vm382_vm1, 0.0, %v828_v49 }
 0x1a9   : > { %v999_v40 = vpop.permute.xlu0 %998 }
 0x1aa   : > { %v1123_v39 = vsel %vm3792_vm12, %v1118_v10, %v999_v40 }
 0x1ac   : > { %v1001_v18 = vpop.permute.xlu1 %1000 }
 0x1ad   : > { %v1124_v19 = vsel %vm3792_vm12, %v1119_v31, %v1001_v18 }
 0x1ae   : > { %v1129_v44 = vsel %vm3789_vm13, %v1124_v19, %v1017_v17 }
 0x1af   : > { %v1059_v32 = vpop.permute.xlu2 %1058 }
 0x1b1   : > { %v1013_v29 = vpop.permute.xlu0 %1012 }
 0x1b2   : > { %v1127_v63 = vsel %vm3789_vm13, %v1122_v59, %v1013_v29 }
 0x1b4   : > { %v1015_v5 = vpop.permute.xlu1 %1014 }
 0x1b5   : > { %v1128_v30 = vsel %vm3789_vm13, %v1123_v39, %v1015_v5 }
 0x1b6   : > { %v1133_v53 = vsel %vm3786_vm14, %v1128_v30, %v1031_v34 }
 0x1b9   : > { %v1027_v23 = vpop.permute.xlu0 %1026 }
 0x1ba   : > { %v1131_v6 = vsel %vm3786_vm14, %v1126_v13, %v1027_v23 }
 0x1bc   : > { %v1029_v33 = vpop.permute.xlu1 %1028 }
 0x1bd   : > { %v1132_v16 = vsel %vm3786_vm14, %v1127_v63, %v1029_v33 }
 0x1be   : > { %v1137_v26 = vsel %vm3787_vm0, %v1132_v16, %v1045_v51 }
 0x1c1   : > { %v1033_v47 = vpop.permute.xlu0 %1032 }
 0x1c2   : > { %v1134_v27 = vsel %vm3786_vm14, %v1129_v44, %v1033_v47 }
 0x1c4   : > { %v1043_v41 = vpop.permute.xlu1 %1042 }
 0x1c5   : > { %v1136_v4 = vsel %vm3787_vm0, %v1131_v6, %v1043_v41 }
 0x1c6   : > { %v1141_v45 = vsel %vm3788_vm15, %v1136_v4, %v1059_v32 }
 0x1c7   : > { %1145 = vxpose.xlu0.b32.start.end [1/1] (short) (narrow) %v1141_v45, 64 }
 0x1c9   : > { %v1047_v11 = vpop.permute.xlu0 %1046 }
 0x1ca   : > { %v1138_v25 = vsel %vm3787_vm0, %v1133_v53, %v1047_v11 }
 0x1d1   : > { %v1061_v22 = vpop.permute.xlu0 %1060 }
 0x1d2   : > { %v1142_v56 = vsel %vm3788_vm15, %v1137_v26, %v1061_v22 }
 0x1d3   : > { %1177 = vxpose.xlu1.b32.start.end [1/1] (short) (narrow) %v1142_v56, 64 }
 0x265   : > { %1048 = vrot.lane.b32.xlu1 %v821_v28, %s2405_s13 }
 0x26b   : > { %v1161_v37 = vpop.trf.xlu0 }
 0x26c   : > { %v1275_v60 = vrot.slane %v1161_v37, 4 }
 0x26d   : > { %1062 = vrot.lane.b32.xlu1 %v717_v2, %s2406_s15 }
 0x273   : > { %v1162_v35 = vpop.trf.xlu0 }
 0x274   : > { %v1331_v31 = vrot.slane %v1162_v35, 4 }
 0x277   : > { %v3225_v1 = vpop.trf.xlu1 }
 0x278   : > { %v1287_v56 = vrot.slane %v3225_v1, 4 }
 0x27b   : > { %v3244_v54 = vpop.trf.xlu0 }
 0x27f   : > { %v3227_v0 = vpop.trf.xlu1 }
 0x283   : > { %v1164_v19 = vpop.trf.xlu0 }
 0x284   : > { %v1443_v5 = vrot.slane %v1164_v19, 4 }
 0x287   : > { %v3229_v61 = vpop.trf.xlu1 }
 0x28b   : > { %v1165_v30 = vpop.trf.xlu0 }
 0x28c   : > { %v1499_v33 = vrot.slane %v1165_v30, 4 }
 0x28f   : > { %v3231_v21 = vpop.trf.xlu1 }
 0x293   : > { %v1166_v8 = vpop.trf.xlu0 }
 0x294   : > { %v1555_v13 = vrot.slane %v1166_v8, 4 }
 0x297   : > { %v3233_v52 = vpop.trf.xlu1 }
 0x29b   : > { %v1167_v4 = vpop.trf.xlu0 }
 0x29c   : > { %v1611_v46 = vrot.slane %v1167_v4, 4 }
 0x29f   : > { %v3235_v14 = vpop.trf.xlu1 }
 0x2a3   : > { %v3286_v26 = vpop.trf.xlu0 }
 0x2a7   : > { %v3237_v36 = vpop.trf.xlu1 }
 0x2af   : > { %v3239_v3 = vpop.trf.xlu1 }
 0x2d7   : > { %v1049_v24 = vpop.permute.xlu1 %1048 }
 0x2d8   : > { %v1139_v62 = vsel %vm3787_vm0, %v1134_v27, %v1049_v24 }
 0x2df   : > { %v1063_v7 = vpop.permute.xlu1 %1062 }
 0x2e0   : > { %v1143_v20 = vsel %vm3788_vm15, %v1138_v25, %v1063_v7 }
 0x2e1   : > { %1209 = vxpose.xlu2.b32.start.end [1/1] (short) (narrow) %v1143_v20, 64 }
 0x37a   : > { %v1225_v48 = vpop.trf.xlu2 }
 0x37b   : > { %v1273_v10 = vrot.slane %v1225_v48, 4  ;;  %v1276_v12 = vsel %vm382_vm1, %v1225_v48, %v1275_v60 }
 0x37d   : > { %v1274_v15 = vsel %vm382_vm1, %v1273_v10, %v1161_v37  ;;  %v1387_v10 = vrot.slane %v3244_v54, 4 }
 0x37e   : > { %v1280_v28 = vperm.slane %v1274_v15, %v2654_v42  ;;  %v1284_v15 = vperm.slane %v1276_v12, %v2654_v42 }
 0x380   : > { %v1299_v37 = vrot.slane %v1280_v28, 4 }
 0x382   : > { %1064 = vrot.lane.b32.xlu2 %v829_v9, %s2406_s15  ;;  %v1226_v17 = vpop.trf.xlu2 }
 0x383   : > { %v1329_v40 = vrot.slane %v1226_v17, 4  ;;  %v3250_v39 = vsel %vm382_vm1, %v1226_v17, %v1331_v31 }
 0x385   : > { %v3253_v18 = vsel %vm382_vm1, %v1329_v40, %v1162_v35 }
 0x38a   : > { %v1227_v44 = vpop.trf.xlu2 }
 0x38b   : > { %v1385_v34 = vrot.slane %v1227_v44, 4 }
 0x38d   : > { %v3257_v29 = vsel %vm382_vm1, %v1385_v34, %v3244_v54 }
 0x392   : > { %v1228_v53 = vpop.trf.xlu2 }
 0x393   : > { %v1441_v23 = vrot.slane %v1228_v53, 4  ;;  %v3260_v58 = vsel %vm382_vm1, %v1228_v53, %v1443_v5 }
 0x395   : > { %v3263_v51 = vsel %vm382_vm1, %v1441_v23, %v1164_v19  ;;  %v1388_v19 = vsel %vm382_vm1, %v1227_v44, %v1387_v10  ;;  %v1399_v23 = vrot.slane %v3229_v61, 4 }
 0x396   : > { %v3312_v53 = vperm.slane %v1388_v19, %v2654_v42 }
 0x39a   : > { %v1229_v43 = vpop.trf.xlu2 }
 0x39b   : > { %v1497_v50 = vrot.slane %v1229_v43, 4  ;;  %v3266_v47 = vsel %vm382_vm1, %v1229_v43, %v1499_v33  ;;  %v1311_v33 = vrot.slane %v1284_v15, 4 }
 0x39d   : > { %v3269_v27 = vsel %vm382_vm1, %v1497_v50, %v1165_v30 }
 0x3a2   : > { %v1230_v6 = vpop.trf.xlu2 }
 0x3a3   : > { %v1553_v41 = vrot.slane %v1230_v6, 4  ;;  %v3272_v32 = vsel %vm382_vm1, %v1230_v6, %v1555_v13  ;;  %v1423_v13 = vrot.slane %v3312_v53, 4 }
 0x3a5   : > { %v3275_v45 = vsel %vm382_vm1, %v1553_v41, %v1166_v8 }
 0x3aa   : > { %v1231_v57 = vpop.trf.xlu2 }
 0x3ab   : > { %v1609_v11 = vrot.slane %v1231_v57, 4  ;;  %v3278_v25 = vsel %vm382_vm1, %v1231_v57, %v1611_v46 }
 0x3ad   : > { %v3281_v59 = vsel %vm382_vm1, %v1609_v11, %v1167_v4 }
 0x3b2   : > { %v3283_v63 = vpop.trf.xlu2 }
 0x3dc   : > { %v1065_v16 = vpop.permute.xlu2 %1064 }
 0x3dd   : > { %v1144_v22 = vsel %vm3788_vm15, %v1139_v62, %v1065_v16 }
 0x3de   : > { %1241 = vxpose.xlu0.b32.start.end [1/1] (short) (narrow) %v1144_v22, 64 }
 0x482   : > { %v1257_v38 = vpop.trf.xlu0 }
 0x483   : > { %v1285_v2 = vrot.slane %v1257_v38, 4  ;;  %v1288_v24 = vsel %vm382_vm1, %v1257_v38, %v1287_v56  ;;  %v1336_v56 = vperm.slane %v3253_v18, %v2654_v42  ;;  %v1343_v18 = vrot.slane %v3227_v0, 4 }
 0x484   : > { %v1296_v7 = vperm.slane %v1288_v24, %v2654_v42 }
 0x485   : > { %v1286_v20 = vsel %vm382_vm1, %v1285_v2, %v3225_v1 }
 0x486   : > { %v1292_v35 = vperm.slane %v1286_v20, %v2654_v42  ;;  %v1309_v60 = vrot.slane %v1296_v7, 4  ;;  %v1312_v4 = vsel %vm382_vm1, %v1296_v7, %v1311_v33 }
 0x487   : > { %v1320_v16 = vperm.slane %v1312_v4, %v2677_v55 }
 0x488   : > { %v1297_v62 = vrot.slane %v1292_v35, 4  ;;  %v1300_v48 = vsel %vm382_vm1, %v1292_v35, %v1299_v37  ;;  %v1310_v40 = vsel %vm382_vm1, %v1309_v60, %v1284_v15  ;;  %v1455_v37 = vrot.slane %v3231_v21, 4 }
 0x489   : > { %v1308_v49 = vperm.slane %v1300_v48, %v2677_v55  ;;  %v1316_v30 = vperm.slane %v1310_v40, %v2677_v55  ;;  %v1327_v24 = vrot.slane %v1320_v16, 4 }
 0x48a   : > { %v1258_v31 = vpop.trf.xlu0  ;;  %v1298_v9 = vsel %vm382_vm1, %v1297_v62, %v1280_v28  ;;  %v1448_v28 = vperm.slane %v3263_v51, %v2654_v42 }
 0x48b   : > { %1726 = vrot.lane.b32.xlu1 %v1308_v49, %s2392_s22  ;;  %v1323_v17 = vrot.slane %v1308_v49, 4  ;;  %v3302_v1 = vperm.slane %v1298_v9, %v2677_v55  ;;  %v1341_v34 = vrot.slane %v1258_v31, 4  ;;  %v1325_v50 = vrot.slane %v1316_v30, 4 }
 0x48c   : > { %v1467_v35 = vrot.slane %v1448_v28, 4  ;;  %v1328_v60 = vsel %vm382_vm1, 0.0, %v1327_v24  ;;  %v1344_v15 = vsel %vm382_vm1, %v1258_v31, %v1343_v18  ;;  %v1452_v31 = vperm.slane %v3260_v58, %v2654_v42 }
 0x48d   : > { %v1324_v54 = vsel %vm382_vm1, 0.0, %v1323_v17  ;;  %v1321_v5 = vrot.slane %v3302_v1, 4  ;;  %v1342_v44 = vsel %vm382_vm1, %v1341_v34, %v3227_v0  ;;  %v1326_v57 = vsel %vm382_vm1, 0.0, %v1325_v50 }
 0x48e   : > { %1730 = vrot.lane.b32.xlu0 %v1324_v54, %s2394_s24  ;;  %v1348_v6 = vperm.slane %v1342_v44, %v2654_v42  ;;  %v1352_v34 = vperm.slane %v1344_v15, %v2654_v42  ;;  %v1340_v50 = vperm.slane %v3250_v39, %v2654_v42  ;;  %v3381_v58 = vperm.slane %v3275_v45, %v2654_v42 }
 0x48f   : > { %v1322_v12 = vsel %vm382_vm1, 0.0, %v1321_v5 }
 0x490   : > { %1722 = vrot.lane.b32.xlu2 %v1322_v12, %s2393_s23  ;;  %v1353_v22 = vrot.slane %v1348_v6, 4  ;;  %v1365_v33 = vrot.slane %v1352_v34, 4  ;;  %v1367_v18 = vrot.slane %v1340_v50, 4 }
 0x492   : > { %v3318_v43 = vpop.trf.xlu0  ;;  %v1354_v7 = vsel %vm382_vm1, %v1353_v22, %v1336_v56  ;;  %v1366_v22 = vsel %vm382_vm1, %v1365_v33, %v1340_v50 }
 0x493   : > { %v1400_v8 = vsel %vm382_vm1, %v3318_v43, %v1399_v23  ;;  %1734 = vrot.lane.b32.xlu1 %v1316_v30, %s3778_s25  ;;  %s3779_s25 = smov 88   ;;  %v1360_v51 = vperm.slane %v1354_v7, %v2677_v55  ;;  %v1397_v39 = vrot.slane %v3318_v43, 4  ;;  %v3406_v43 = vperm.slane %v3278_v25, %v2654_v42 }
 0x494   : > { %v3326_v41 = vperm.slane %v1400_v8, %v2654_v42  ;;  %v1623_v25 = vrot.slane %v3237_v36, 4 }
 0x495   : > { %v1377_v40 = vrot.slane %v1360_v51, 4 }
 0x496   : > { %v1424_v46 = vsel %vm382_vm1, %v3326_v41, %v1423_v13  ;;  %v1479_v13 = vrot.slane %v1452_v31, 4 }
 0x497   : > { %v3333_v11 = vperm.slane %v1424_v46, %v2677_v55  ;;  %v1378_v30 = vsel %vm382_vm1, 0.0, %v1377_v40 }
 0x498   : > { %1738 = vrot.lane.b32.xlu2 %v1326_v57, %s2396_s26 }
 0x499   : > { %1806 = vrot.lane.b32.xlu0 %v3333_v11, %s3779_s25  ;;  %s3780_s25 = smov 100  }
 0x49a   : > { %v1260_v38 = vpop.trf.xlu0 }
 0x49b   : > { %v1453_v2 = vrot.slane %v1260_v38, 4  ;;  %1742 = vrot.lane.b32.xlu1 %v1320_v16, %s2397_s27  ;;  %v1456_v48 = vsel %vm382_vm1, %v1260_v38, %v1455_v37  ;;  %v1579_v38 = vrot.slane %v3381_v58, 4 }
 0x49c   : > { %v1464_v0 = vperm.slane %v1456_v48, %v2654_v42  ;;  %v1647_v48 = vrot.slane %v3406_v43, 4 }
 0x49d   : > { %v1454_v20 = vsel %vm382_vm1, %v1453_v2, %v3231_v21  ;;  %v1355_v21 = vrot.slane %v1336_v56, 4 }
 0x49e   : > { %v1460_v62 = vperm.slane %v1454_v20, %v2654_v42  ;;  %v1477_v12 = vrot.slane %v1464_v0, 4  ;;  %v1480_v16 = vsel %vm382_vm1, %v1464_v0, %v1479_v13  ;;  %v1372_v20 = vperm.slane %v1366_v22, %v2677_v55 }
 0x49f   : > { %v1356_v54 = vsel %vm382_vm1, %v1348_v6, %v1355_v21  ;;  %v3411_v37 = vperm.slane %v1480_v16, %v2677_v55 }
 0x4a0   : > { %v1465_v10 = vrot.slane %v1460_v62, 4  ;;  %1746 = vrot.lane.b32.xlu2 %v1328_v60, %s2398_s28  ;;  %v3355_v49 = vsel %vm382_vm1, %v1460_v62, %v1467_v35  ;;  %v1364_v44 = vperm.slane %v1356_v54, %v2677_v55  ;;  %v1478_v57 = vsel %vm382_vm1, %v1477_v12, %v1452_v31 }
 0x4a1   : > { %v3402_v24 = vperm.slane %v1478_v57, %v2677_v55  ;;  %v1398_v62 = vsel %vm382_vm1, %v1397_v39, %v3229_v61  ;;  %v1381_v15 = vrot.slane %v1372_v20, 4  ;;  %v1495_v21 = vrot.slane %v3411_v37, 4 }
 0x4a2   : > { %v3358_v9 = vpop.trf.xlu0  ;;  %v1466_v17 = vsel %vm382_vm1, %v1465_v10, %v1448_v28  ;;  %v1379_v46 = vrot.slane %v1364_v44, 4  ;;  %v3397_v28 = vperm.slane %v3269_v27, %v2654_v42  ;;  %v1404_v0 = vperm.slane %v1398_v62, %v2654_v42 }
 0x4a3   : > { %1750 = vrot.lane.b32.xlu1 %v1360_v51, %s2399_s29  ;;  %v3364_v19 = vperm.slane %v1466_v17, %v2677_v55  ;;  %v1509_v8 = vrot.slane %v3358_v9, 4  ;;  %v1368_v17 = vsel %vm382_vm1, %v1352_v34, %v1367_v18  ;;  %v1496_v31 = vsel %vm382_vm1, 0.0, %v1495_v21 }
 0x4a4   : > { %v1380_v7 = vsel %vm382_vm1, 0.0, %v1379_v46  ;;  %v1523_v60 = vrot.slane %v3397_v28, 4  ;;  %v1376_v12 = vperm.slane %v1368_v17, %v2677_v55  ;;  %v1421_v62 = vrot.slane %v3326_v41, 4 }
 0x4a5   : > { %v1489_v5 = vrot.slane %v3364_v19, 4  ;;  %v1510_v56 = vsel %vm382_vm1, %v1509_v8, %v3233_v52 }
 0x4a6   : > { %v3414_v27 = vperm.slane %v1510_v56, %v2654_v42  ;;  %v1383_v33 = vrot.slane %v1376_v12, 4  ;;  %v1422_v41 = vsel %vm382_vm1, %v1421_v62, %v3312_v53 }
 0x4a7   : > { %v1490_v23 = vsel %vm382_vm1, 0.0, %v1489_v5  ;;  %v1382_v5 = vsel %vm382_vm1, 0.0, %v1381_v15  ;;  %v1428_v21 = vperm.slane %v1422_v41, %v2677_v55 }
 0x4a8   : > { %1754 = vrot.lane.b32.xlu2 %v1378_v30, %s2400_s30  ;;  %1818 = vrot.lane.b32.xlu0 %v1490_v23, %s3780_s25  ;;  %s3782_s25 = smov 112   ;;  %v1524_v40 = vsel %vm382_vm1, %v3414_v27, %v1523_v60  ;;  %v1409_v30 = vrot.slane %v1404_v0, 4  ;;  %v1511_v23 = vrot.slane %v3233_v52, 4  ;;  %v1384_v52 = vsel %vm382_vm1, 0.0, %v1383_v33 }
 0x4a9   : > { %v3448_v34 = vperm.slane %v1524_v40, %v2677_v55  ;;  %v1437_v53 = vrot.slane %v1428_v21, 4  ;;  %v3528_v33 = vperm.slane %v3281_v59, %v2654_v42 }
 0x4aa   : > { %v3383_v6 = vpop.trf.xlu0  ;;  %v1512_v50 = vsel %vm382_vm1, %v3358_v9, %v1511_v23 }
 0x4ab   : > { %v1565_v4 = vrot.slane %v3383_v6, 4  ;;  %1758 = vrot.lane.b32.xlu1 %v1364_v44, %s2401_s2  ;;  %v1392_v44 = vperm.slane %v3257_v29, %v2654_v42  ;;  %v1547_v8 = vrot.slane %v3448_v34, 4  ;;  %v3465_v46 = vperm.slane %v1512_v50, %v2654_v42 }
 0x4ac   : > { %v1476_v50 = vperm.slane %v3355_v49, %v2677_v55 }
 0x4ad   : > { %v1566_v45 = vsel %vm382_vm1, %v1565_v4, %v3235_v14  ;;  %v1410_v13 = vsel %vm382_vm1, %v1409_v30, %v1392_v44  ;;  %v3462_v4 = vperm.slane %v3266_v47, %v2654_v42  ;;  %v1548_v29 = vsel %vm382_vm1, 0.0, %v1547_v8 }
 0x4ae   : > { %v1572_v2 = vperm.slane %v1566_v45, %v2654_v42  ;;  %v1416_v57 = vperm.slane %v1410_v13, %v2677_v55  ;;  %v1411_v22 = vrot.slane %v1392_v44, 4 }
 0x4af   : > { %v1535_v9 = vrot.slane %v3462_v4, 4 }
 0x4b0   : > { %1762 = vrot.lane.b32.xlu2 %v1380_v7, %s2402_s3  ;;  %1830 = vrot.lane.b32.xlu0 %v3402_v24, %s3782_s25  ;;  %v3420_v35 = vsel %vm382_vm1, %v1572_v2, %v1579_v38  ;;  %v1577_v16 = vrot.slane %v1572_v2, 4  ;;  %v1433_v39 = vrot.slane %v1416_v57, 4  ;;  %v1412_v56 = vsel %vm382_vm1, %v1404_v0, %v1411_v22  ;;  %s2412_s25 = smov 72  }
 0x4b1   : > { %v1536_v47 = vsel %vm382_vm1, %v3465_v46, %v1535_v9  ;;  %v1567_v38 = vrot.slane %v3235_v14, 4  ;;  %v1665_v9 = vrot.slane %v3283_v63, 4 }
 0x4b2   : > { %v3426_v51 = vpop.trf.xlu0  ;;  %v1578_v45 = vsel %vm382_vm1, %v1577_v16, %v3381_v58  ;;  %v3481_v2 = vperm.slane %v1536_v47, %v2677_v55  ;;  %v1434_v7 = vsel %vm382_vm1, 0.0, %v1433_v39  ;;  %v1493_v16 = vrot.slane %v3402_v24, 4 }
 0x4b3   : > { %v1624_v10 = vsel %vm382_vm1, %v3426_v51, %v1623_v25  ;;  %1766 = vrot.lane.b32.xlu1 %v1372_v20, %s2403_s4  ;;  %v1420_v20 = vperm.slane %v1412_v56, %v2677_v55  ;;  %v3486_v25 = vperm.slane %v1578_v45, %v2677_v55  ;;  %v1568_v18 = vsel %vm382_vm1, %v3383_v6, %v1567_v38 }
 0x4b4   : > { %v3436_v61 = vperm.slane %v1624_v10, %v2654_v42  ;;  %v1576_v14 = vperm.slane %v1568_v18, %v2654_v42  ;;  %v1564_v6 = vperm.slane %v3272_v32, %v2654_v42  ;;  %v1621_v30 = vrot.slane %v3426_v51, 4 }
 0x4b5   : > { %v1435_v58 = vrot.slane %v1420_v20, 4  ;;  %v1601_v60 = vrot.slane %v3486_v25, 4  ;;  %v1666_v45 = vsel %vm382_vm1, %v1665_v9, %v3286_v26 }
 0x4b6   : > { %v3442_v54 = vsel %vm382_vm1, %v3436_v61, %v1647_v48  ;;  %v1589_v48 = vrot.slane %v1576_v14, 4  ;;  %v1591_v17 = vrot.slane %v1564_v6, 4  ;;  %v1622_v44 = vsel %vm382_vm1, %v1621_v30, %v3237_v36 }
 0x4b7   : > { %v1436_v10 = vsel %vm382_vm1, 0.0, %v1435_v58  ;;  %v1602_v15 = vsel %vm382_vm1, 0.0, %v1601_v60  ;;  %v3531_v51 = vperm.slane %v1622_v44, %v2654_v42  ;;  %v1645_v13 = vrot.slane %v3436_v61, 4 }
 0x4b8   : > { %1770 = vrot.lane.b32.xlu2 %v1382_v5, %s2404_s12  ;;  %1842 = vrot.lane.b32.xlu0 %v1496_v31, %s3781_s16  ;;  %s2410_s16 = smov 64   ;;  %v1590_v0 = vsel %vm382_vm1, %v1589_v48, %v1564_v6  ;;  %v1592_v32 = vsel %vm382_vm1, %v1576_v14, %v1591_v17  ;;  %v1439_v5 = vrot.slane %v3333_v11, 4  ;;  %v1438_v31 = vsel %vm382_vm1, 0.0, %v1437_v53 }
 0x4b9   : > { %v3510_v40 = vperm.slane %v1590_v0, %v2677_v55  ;;  %v1635_v36 = vrot.slane %v3528_v33, 4  ;;  %v1646_v61 = vsel %vm382_vm1, %v1645_v13, %v3406_v43  ;;  %v1494_v43 = vsel %vm382_vm1, 0.0, %v1493_v16 }
 0x4ba   : > { %v1440_v23 = vsel %vm382_vm1, 0.0, %v1439_v5  ;;  %v1264_v59 = vpop.trf.xlu0  ;;  %v3554_v22 = vperm.slane %v1646_v61, %v2677_v55  ;;  %v1533_v14 = vrot.slane %v3465_v46, 4  ;;  %v1667_v46 = vrot.slane %v3286_v26, 4 }
 0x4bb   : > { %1774 = vrot.lane.b32.xlu1 %v1376_v12, %s2405_s13  ;;  %v3515_v12 = vperm.slane %v1592_v32, %v2677_v55  ;;  %v1636_v49 = vsel %vm382_vm1, %v3531_v51, %v1635_v36  ;;  %v1551_v30 = vrot.slane %v3481_v2, 4  ;;  %v1605_v9 = vrot.slane %v3510_v40, 4 }
 0x4bc   : > { %v1661_v38 = vrot.slane %v3554_v22, 4  ;;  %v1534_v48 = vsel %vm382_vm1, %v1533_v14, %v3462_v4  ;;  %v1679_v4 = vrot.slane %v3239_v3, 4  ;;  %v1668_v17 = vsel %vm382_vm1, %v3283_v63, %v1667_v46 }
 0x4bd   : > { %v1607_v11 = vrot.slane %v3515_v12, 4  ;;  %v3604_v5 = vperm.slane %v1668_v17, %v2654_v42  ;;  %v1552_v13 = vsel %vm382_vm1, 0.0, %v1551_v30 }
 0x4be   : > { %v1662_v18 = vsel %vm382_vm1, 0.0, %v1661_v38  ;;  %v1680_v32 = vsel %vm382_vm1, %v1264_v59, %v1679_v4 }
 0x4bf   : > { %v1608_v8 = vsel %vm382_vm1, 0.0, %v1607_v11  ;;  %v3611_v63 = vperm.slane %v1680_v32, %v2654_v42 }
 0x4c0   : > { %1778 = vrot.lane.b32.xlu2 %v1384_v52, %s2406_s15  ;;  %1854 = vrot.lane.b32.xlu0 %v1548_v29, %s2394_s24  ;;  %s3783_s24 = smov 68   ;;  %v1521_v52 = vrot.slane %v3414_v27, 4  ;;  %v1491_v29 = vrot.slane %v1476_v50, 4 }
 0x4c2   : > { %v1492_v27 = vsel %vm382_vm1, 0.0, %v1491_v29  ;;  %v1522_v47 = vsel %vm382_vm1, %v1521_v52, %v3397_v28  ;;  %v1588_v52 = vperm.slane %v3420_v35, %v2677_v55 }
 0x4c3   : > { %1782 = vrot.lane.b32.xlu1 %v1416_v57, %s2410_s16  ;;  %v1677_v57 = vrot.slane %v1264_v59, 4  ;;  %v3565_v56 = vperm.slane %v1522_v47, %v2677_v55  ;;  %v1633_v47 = vrot.slane %v3531_v51, 4 }
 0x4c5   : > { %v1678_v39 = vsel %vm382_vm1, %v1677_v57, %v3239_v3  ;;  %v1603_v57 = vrot.slane %v1588_v52, 4 }
 0x4c6   : > { %v1684_v28 = vperm.slane %v1678_v39, %v2654_v42  ;;  %v1606_v39 = vsel %vm382_vm1, 0.0, %v1605_v9 }
 0x4c8   : > { %1786 = vrot.lane.b32.xlu2 %v1434_v7, %s3783_s24  ;;  %1866 = vrot.lane.b32.xlu0 %v3481_v2, %s2397_s27  ;;  %s2413_s27 = smov 76   ;;  %s3784_s24 = smov 80   ;;  %v1672_v7 = vperm.slane %v1666_v45, %v2654_v42  ;;  %v1689_v62 = vrot.slane %v1684_v28, 4 }
 0x4ca   : > { %v1691_v58 = vrot.slane %v1672_v7, 4  ;;  %v1690_v6 = vsel %vm382_vm1, %v1689_v62, %v1672_v7 }
 0x4cb   : > { %1790 = vrot.lane.b32.xlu1 %v1420_v20, %s2412_s25  ;;  %v1545_v20 = vrot.slane %v3565_v56, 4 }
 0x4cd   : > { %v1546_v41 = vsel %vm382_vm1, 0.0, %v1545_v20 }
 0x4d0   : > { %1794 = vrot.lane.b32.xlu2 %v1436_v10, %s2413_s27  ;;  %1878 = vrot.lane.b32.xlu0 %v1602_v15, %s2400_s30  ;;  %s2415_s30 = smov 84   ;;  %v1692_v10 = vsel %vm382_vm1, %v1684_v28, %v1691_v58  ;;  %v3587_v15 = vperm.slane %v1690_v6, %v2677_v55 }
 0x4d3   : > { %1798 = vrot.lane.b32.xlu1 %v1428_v21, %s3784_s24  ;;  %s3785_s24 = smov 92   ;;  %v3591_v21 = vperm.slane %v1692_v10, %v2677_v55 }
 0x4d5   : > { %v1715_v0 = vrot.slane %v3591_v21, 4 }
 0x4d7   : > { %v1716_v11 = vsel %vm382_vm1, 0.0, %v1715_v0 }
 0x4d8   : > { %1802 = vrot.lane.b32.xlu2 %v1438_v31, %s2415_s30  ;;  %1890 = vrot.lane.b32.xlu0 %v3510_v40, %s2403_s4  ;;  %s2417_s4 = smov 96  }
 0x4db   : > { %1810 = vrot.lane.b32.xlu1 %v1440_v23, %s3785_s24  ;;  %s2418_s24 = smov 104  }
 0x4e0   : > { %1814 = vrot.lane.b32.xlu2 %v3364_v19, %s2417_s4  ;;  %1902 = vrot.lane.b32.xlu0 %v1608_v8, %s2406_s15  ;;  %v3548_v19 = vperm.slane %v1636_v49, %v2677_v55  ;;  %s2419_s15 = smov 108   ;;  %v1703_v8 = vrot.slane %v3604_v5, 4 }
 0x4e2   : > { %v1704_v42 = vsel %vm382_vm1, %v3611_v63, %v1703_v8  ;;  %v1659_v62 = vrot.slane %v3548_v19, 4 }
 0x4e3   : > { %1822 = vrot.lane.b32.xlu1 %v1476_v50, %s2418_s24  ;;  %v3625_v59 = vperm.slane %v1704_v42, %v2677_v55 }
 0x4e4   : > { %v1660_v58 = vsel %vm382_vm1, 0.0, %v1659_v62 }
 0x4e8   : > { %1826 = vrot.lane.b32.xlu2 %v1492_v27, %s2419_s15  ;;  %1914 = vrot.lane.b32.xlu0 %v3548_v19, %s2412_s25  ;;  %v1604_v27 = vsel %vm382_vm1, 0.0, %v1603_v57  ;;  %s3809_s25 = smov 92  }
 0x4ea   : > { %v1723_v24 = vpop.permute.xlu2 %1722 }
 0x4eb   : > { %1834 = vrot.lane.b32.xlu1 %v1494_v43, %s2389_s18 }
 0x4f0   : > { %1838 = vrot.lane.b32.xlu2 %v3411_v37, %s2388_s17  ;;  %1926 = vrot.lane.b32.xlu0 %v1662_v18, %s2415_s30  ;;  %v1540_v37 = vperm.slane %v1534_v48, %v2677_v55 }
 0x4f2   : > { %v1739_v60 = vpop.permute.xlu2 %1738  ;;  %v1549_v53 = vrot.slane %v1540_v37, 4 }
 0x4f3   : > { %1846 = vrot.lane.b32.xlu1 %v1546_v41, %s2393_s23  ;;  %s3805_s23 = smov 16   ;;  %v1656_v41 = vperm.slane %v3442_v54, %v2677_v55  ;;  %v1701_v54 = vrot.slane %v3611_v63, 4 }
 0x4f4   : > { %v1550_v23 = vsel %vm382_vm1, 0.0, %v1549_v53 }
 0x4f5   : > { %v1663_v48 = vrot.slane %v1656_v41, 4  ;;  %v1702_v0 = vsel %vm382_vm1, %v1701_v54, %v3604_v5 }
 0x4f7   : > { %v1664_v4 = vsel %vm382_vm1, 0.0, %v1663_v48 }
 0x4f8   : > { %1850 = vrot.lane.b32.xlu2 %v3448_v34, %s2392_s22  ;;  %1938 = vrot.lane.b32.xlu0 %v3587_v15, %s2417_s4  ;;  %v1969_v34 = vsel %vm1070_vm2, %v3302_v1, %v1723_v24  ;;  %v1634_v24 = vsel %vm382_vm1, %v1633_v47, %v3528_v33  ;;  %s3808_s22 = smov 88  }
 0x4f9   : > { %v1640_v40 = vperm.slane %v1634_v24, %v2677_v55 }
 0x4fa   : > { %v1747_v26 = vpop.permute.xlu2 %1746 }
 0x4fb   : > { %1858 = vrot.lane.b32.xlu1 %v1540_v37, %s3805_s23  ;;  %v1657_v38 = vrot.slane %v1640_v40, 4  ;;  %v1713_v37 = vrot.slane %v3587_v15, 4 }
 0x4fd   : > { %v1727_v31 = vpop.permute.xlu1 %1726  ;;  %v1658_v33 = vsel %vm382_vm1, 0.0, %v1657_v38 }
 0x4fe   : > { %v1970_v3 = vsel %vm1075_vm3, %v1969_v34, %v1727_v31  ;;  %v1708_v34 = vperm.slane %v1702_v0, %v2677_v55 }
 0x500   : > { %1862 = vrot.lane.b32.xlu2 %v1550_v23, %s2396_s26  ;;  %1950 = vrot.lane.b32.xlu0 %v1716_v11, %s2419_s15  ;;  %v1731_v44 = vpop.permute.xlu0 %1730  ;;  %s3810_s26 = smov 100   ;;  %v1717_v30 = vrot.slane %v1708_v34, 4  ;;  %v1719_v11 = vrot.slane %v3625_v59, 4 }
 0x501   : > { %v1971_v1 = vsel %vm1080_vm5, %v1970_v3, %v1731_v44 }
 0x502   : > { %v1755_v50 = vpop.permute.xlu2 %1754  ;;  %v1718_v44 = vsel %vm382_vm1, 0.0, %v1717_v30 }
 0x503   : > { %1870 = vrot.lane.b32.xlu1 %v1552_v13, %s2398_s28  ;;  %s3811_s28 = smov 112  }
 0x505   : > { %v1735_v2 = vpop.permute.xlu1 %1734 }
 0x506   : > { %v1972_v36 = vsel %vm1085_vm4, %v1971_v1, %v1735_v2 }
 0x507   : > { %v1973_v29 = vsel %vm1090_vm6, %v1972_v36, %v1739_v60 }
 0x508   : > { %1874 = vrot.lane.b32.xlu2 %v3486_v25, %s2399_s29  ;;  %1962 = vrot.lane.b32.xlu0 %v3625_v59, %s2388_s17  ;;  %s3806_s17 = smov 68   ;;  %s3812_s29 = smov 124  }
 0x50a   : > { %v1763_v49 = vpop.permute.xlu2 %1762 }
 0x50b   : > { %1882 = vrot.lane.b32.xlu1 %v1588_v52, %s2401_s2  ;;  %v1807_v53 = vpop.permute.xlu0 %1806  ;;  %s2172_s2 = sshll.u32 %s2375_s9, 3  ;;  %s2054_s9 = scalar_lea.sflag [#allocation4], %s2504_s5 }
 0x50d   : > { %v1743_v61 = vpop.permute.xlu1 %1742 }
 0x50e   : > { %v1974_v16 = vsel %vm1095_vm7, %v1973_v29, %v1743_v61 }
 0x50f   : > { %v1975_v35 = vsel %vm1100_vm8, %v1974_v16, %v1747_v26 }
 0x510   : > { %1886 = vrot.lane.b32.xlu2 %v1604_v27, %s2402_s3 }
 0x512   : > { %v1771_v25 = vpop.permute.xlu2 %1770 }
 0x513   : > { %1894 = vrot.lane.b32.xlu1 %v1606_v39, %s2404_s12 }
 0x515   : > { %v1751_v43 = vpop.permute.xlu1 %1750 }
 0x516   : > { %v1976_v45 = vsel %vm1105_vm9, %v1975_v35, %v1751_v43 }
 0x517   : > { %v1977_v28 = vsel %vm3796_vm10, %v1976_v45, %v1755_v50  ;;  %vm2006_vm10 = vcmask 883712  }
 0x518   : > { %1898 = vrot.lane.b32.xlu2 %v3515_v12, %s2405_s13  ;;  %s2067_s13 = scalar_lea.hbm %s3776_s1, %s2172_s2 }
 0x519   : > { %s2071_s30 = sshll.u32 %s2067_s13, 4  ;;  %s2072_s30 = int_to_ptr.hbm [resolvable:$true] %s2071_s30 }
 0x51a   : > { %v1779_v51 = vpop.permute.xlu2 %1778  ;;  %v1819_v63 = vpop.permute.xlu0 %1818  ;;  %s2315_s4 = sshra.s32 %s2072_s30, 4  ;;  %s2316_s4 = int_to_ptr.hbm [resolvable:$true] %s2315_s4 }
 0x51b   : > { %1906 = vrot.lane.b32.xlu1 %v1640_v40, %s2410_s16  ;;  %s3807_s16 = smov 80   ;;  %s2317_s15 = scalar_lea.hbm %s2316_s4, 8 }
 0x51c   : > { %p2318_p4 = scmp.ne.s32.totalorder %s2316_s4, %s2317_s15  ;;  %p2322_p7 = scmp.lt.s32.totalorder %s2316_s4, %s3776_s1 }
 0x51d   : > { %v1759_v7 = vpop.permute.xlu1 %1758 }
 0x51e   : > { %v1978_v20 = vsel %vm3795_vm11, %v1977_v28, %v1759_v7  ;;  %vm2002_vm11 = vcmask 818176   ;;  %p2319_p5 = pnand %p2318_p4, %p2481_p9 }
 0x51f   : > { %v1979_v18 = vsel %vm3792_vm12, %v1978_v20, %v1763_v49  ;;  %vm3798_vm12 = vcmask 719872  }
 0x520   : > { %1910 = vrot.lane.b32.xlu2 %v1658_v33, %s3806_s17  ;;  %p2320_p6 = pneg %p2319_p5 }
 0x522   : > { %v1787_v14 = vpop.permute.xlu2 %1786  ;;  %v1831_v50 = vpop.permute.xlu0 %1830 }
 0x523   : > { %1918 = vrot.lane.b32.xlu1 %v1660_v58, %s2413_s27 }
 0x525   : > { %v1767_v12 = vpop.permute.xlu1 %1766 }
 0x526   : > { %v1980_v60 = vsel %vm3789_vm13, %v1979_v18, %v1767_v12  ;;  %vm3794_vm13 = vcmask 621568  }
 0x527   : > { %v1981_v6 = vsel %vm3786_vm14, %v1980_v60, %v1771_v25  ;;  %vm3791_vm14 = vcmask 523264  }
 0x528   : > { %1922 = vrot.lane.b32.xlu2 %v3554_v22, %s3807_s16  ;;  %v1714_v22 = vsel %vm382_vm1, 0.0, %v1713_v37  ;;  %s2321_s16 = scalar_lea.hbm %s3776_s1, 16 }
 0x529   : > { %p2323_p8 = scmp.lt.s32.totalorder %s2321_s16, %s2317_s15 }
 0x52a   : > { %v1795_v19 = vpop.permute.xlu2 %1794  ;;  %v1843_v49 = vpop.permute.xlu0 %1842 }
 0x52b   : > { %1930 = vrot.lane.b32.xlu1 %v1656_v41, %s3808_s22  ;;  %p2324_p10 = por %p2323_p8, %p2322_p7 }
 0x52d   : > { %v1775_v10 = vpop.permute.xlu1 %1774  ;;  %p2325_p13 = pnand %p2324_p10, %p2320_p6 }
 0x52e   : > { %v1982_v46 = vsel %vm3787_vm0, %v1981_v6, %v1775_v10  ;;  %vm3790_vm0 = vcmask 556032  }
 0x52f   : > { %v1983_v17 = vsel %vm3788_vm15, %v1982_v46, %v1779_v51  ;;  %vm3793_vm15 = vcmask 588800  }
 0x530   : > { %1934 = vrot.lane.b32.xlu2 %v1664_v4, %s3809_s25 }
 0x532   : > { %v1803_v26 = vpop.permute.xlu2 %1802  ;;  %v1855_v47 = vpop.permute.xlu0 %1854 }
 0x533   : > { %1942 = vrot.lane.b32.xlu1 %v1714_v22, %s3810_s26 }
 0x535   : > { %v1783_v15 = vpop.permute.xlu1 %1782 }
 0x536   : > { %v1985_v32 = vsel %vm3791_vm14, %v1983_v17, %v1783_v15  ;;  %vm3799_vm14 = vcmask 687104  }
 0x537   : > { %v1987_v31 = vsel %vm3790_vm0, %v1985_v32, %v1787_v14  ;;  %vm3797_vm0 = vcmask 654336  }
 0x538   : > { %1946 = vrot.lane.b32.xlu2 %v3591_v21, %s2418_s24  ;;  %v1720_v21 = vsel %vm382_vm1, 0.0, %v1719_v11  ;;  %vm2004_vm1 = vcmask 850944  }
 0x53a   : > { %v1815_v3 = vpop.permute.xlu2 %1814  ;;  %v1867_v40 = vpop.permute.xlu0 %1866 }
 0x53b   : > { %1954 = vrot.lane.b32.xlu1 %v1708_v34, %s3811_s28 }
 0x53d   : > { %v1791_v23 = vpop.permute.xlu1 %1790 }
 0x53e   : > { %v1989_v5 = vsel %vm3793_vm15, %v1987_v31, %v1791_v23  ;;  %vm3800_vm15 = vcmask 752640  }
 0x53f   : > { %v1991_v55 = vsel %vm3794_vm13, %v1989_v5, %v1795_v19  ;;  %vm2000_vm13 = vcmask 785408  }
 0x540   : > { %1958 = vrot.lane.b32.xlu2 %v1718_v44, %s2389_s18  ;;  %s2165_s18 = sshll.u32 %s2504_s5, 3 }
 0x541   : > { %s154_s24 = scalar_lea.vmem [#allocation5], %s2165_s18 }
 0x542   : > { %v1827_v8 = vpop.permute.xlu2 %1826  ;;  %v1879_v7 = vpop.permute.xlu0 %1878  ;;  %s2069_s27 = sshll.u32 %s154_s24, 4  ;;  %s2070_s27 = int_to_ptr.vmem [resolvable:$true] %s2069_s27 }
 0x543   : > { %1966 = vrot.lane.b32.xlu1 %v1720_v21, %s3812_s29 }
 0x545   : > { %v1799_v1 = vpop.permute.xlu1 %1798 }
 0x546   : > { %v1993_v13 = vsel %vm3797_vm0, %v1991_v55, %v1799_v1  ;;  %vm2008_vm0 = vcmask 916480  }
 0x547   : > { %v1995_v42 = vsel %vm3799_vm14, %v1993_v13, %v1803_v26  ;;  %vm2012_vm14 = vcmask 982016  }
 0x548   : > { %v1997_v2 = vsel %vm3798_vm12, %v1995_v42, %v1807_v53  ;;  %vm2010_vm12 = vcmask 949248  }
 0x54a   : > { %v1839_v36 = vpop.permute.xlu2 %1838  ;;  %v1891_v12 = vpop.permute.xlu0 %1890 }
 0x54d   : > { %v1811_v59 = vpop.permute.xlu1 %1810 }
 0x54e   : > { %v1999_v52 = vsel %vm3800_vm15, %v1997_v2, %v1811_v59  ;;  %vm2014_vm15 = vcmask 1014784  }
 0x54f   : > { %v2001_v29 = vsel %vm2000_vm13, %v1999_v52, %v1815_v3 }
 0x550   : > { %v2003_v57 = vsel %vm2002_vm11, %v2001_v29, %v1819_v63 }
 0x552   : > { %v1851_v9 = vpop.permute.xlu2 %1850 }
 0x555   : > { %v1823_v61 = vpop.permute.xlu1 %1822 }
 0x556   : > { %v2005_v16 = vsel %vm2004_vm1, %v2003_v57, %v1823_v61 }
 0x557   : > { %v2007_v27 = vsel %vm2006_vm10, %v2005_v16, %v1827_v8 }
 0x558   : > { %v2009_v35 = vsel %vm2008_vm0, %v2007_v27, %v1831_v50 }
 0x55a   : > { %v1863_v45 = vpop.permute.xlu2 %1862 }
 0x55d   : > { %v1835_v25 = vpop.permute.xlu1 %1834 }
 0x55e   : > { %v2011_v39 = vsel %vm2010_vm12, %v2009_v35, %v1835_v25 }
 0x55f   : > { %v2013_v24 = vsel %vm2012_vm14, %v2011_v39, %v1839_v36 }
 0x560   : > { %v3700_v43 = vsel %vm2014_vm15, %v2013_v24, %v1843_v49 }
 0x562   : > { %v1875_v51 = vpop.permute.xlu2 %1874 }
 0x565   : > { %v1847_v28 = vpop.permute.xlu1 %1846 }
 0x566   : > { %v2016_v20 = vsel %vm1070_vm2, %v3565_v56, %v1847_v28  ;;  %v1903_v56 = vpop.permute.xlu0 %1902  ;;  %vm3813_vm2 = vcmask 293888  }
 0x567   : > { %v2017_v62 = vsel %vm1075_vm3, %v2016_v20, %v1851_v9  ;;  %vm3814_vm3 = vcmask 326656  }
 0x568   : > { %v2018_v14 = vsel %vm1080_vm5, %v2017_v62, %v1855_v47  ;;  %vm3815_vm5 = vcmask 359424  }
 0x56a   : > { %v1887_v33 = vpop.permute.xlu2 %1886 }
 0x56d   : > { %v1859_v38 = vpop.permute.xlu1 %1858 }
 0x56e   : > { %v2019_v58 = vsel %vm1085_vm4, %v2018_v14, %v1859_v38  ;;  %vm3816_vm4 = vcmask 392192   ;;  %v1915_v22 = vpop.permute.xlu0 %1914 }
 0x56f   : > { %v2020_v60 = vsel %vm1090_vm6, %v2019_v58, %v1863_v45  ;;  %vm3817_vm6 = vcmask 424960  }
 0x570   : > { %v2021_v41 = vsel %vm1095_vm7, %v2020_v60, %v1867_v40  ;;  %vm3818_vm7 = vcmask 457728  }
 0x572   : > { %v1899_v48 = vpop.permute.xlu2 %1898 }
 0x575   : > { %v1871_v18 = vpop.permute.xlu1 %1870 }
 0x576   : > { %v2022_v19 = vsel %vm1100_vm8, %v2021_v41, %v1871_v18  ;;  %vm3819_vm8 = vcmask 490496   ;;  %v1927_v30 = vpop.permute.xlu0 %1926 }
 0x577   : > { %v2023_v10 = vsel %vm1105_vm9, %v2022_v19, %v1875_v51  ;;  %vm3820_vm9 = vcmask 523264  }
 0x578   : > { %v2024_v46 = vsel %vm3813_vm2, %v2023_v10, %v1879_v7  ;;  %vm3821_vm2 = vcmask 556032  }
 0x57a   : > { %v1911_v54 = vpop.permute.xlu2 %1910 }
 0x57d   : > { %v1883_v6 = vpop.permute.xlu1 %1882 }
 0x57e   : > { %v2025_v37 = vsel %vm3814_vm3, %v2024_v46, %v1883_v6  ;;  %vm3822_vm3 = vcmask 588800   ;;  %v1939_v21 = vpop.permute.xlu0 %1938 }
 0x57f   : > { %v2026_v17 = vsel %vm3815_vm5, %v2025_v37, %v1887_v33  ;;  %vm3823_vm5 = vcmask 621568  }
 0x580   : > { %v2027_v26 = vsel %vm3816_vm4, %v2026_v17, %v1891_v12  ;;  %vm3824_vm4 = vcmask 654336  }
 0x582   : > { %v1923_v34 = vpop.permute.xlu2 %1922 }
 0x585   : > { %v1895_v4 = vpop.permute.xlu1 %1894 }
 0x586   : > { %v2028_v53 = vsel %vm3817_vm6, %v2027_v26, %v1895_v4  ;;  %vm3825_vm6 = vcmask 687104   ;;  %v1951_v59 = vpop.permute.xlu0 %1950 }
 0x587   : > { %v2029_v15 = vsel %vm3818_vm7, %v2028_v53, %v1899_v48  ;;  %vm3826_vm7 = vcmask 719872  }
 0x588   : > { %v2030_v32 = vsel %vm3819_vm8, %v2029_v15, %v1903_v56  ;;  %vm3827_vm8 = vcmask 752640  }
 0x58a   : > { %v1935_v11 = vpop.permute.xlu2 %1934 }
 0x58d   : > { %v1907_v0 = vpop.permute.xlu1 %1906 }
 0x58e   : > { %v2031_v31 = vsel %vm3820_vm9, %v2030_v32, %v1907_v0  ;;  %v1963_v9 = vpop.permute.xlu0 %1962 }
 0x58f   : > { %v2032_v63 = vsel %vm3821_vm2, %v2031_v31, %v1911_v54 }
 0x590   : > { %v2033_v23 = vsel %vm3822_vm3, %v2032_v63, %v1915_v22 }
 0x592   : > { %v1947_v42 = vpop.permute.xlu2 %1946 }
 0x595   : > { %v1919_v3 = vpop.permute.xlu1 %1918 }
 0x596   : > { %v2034_v5 = vsel %vm3823_vm5, %v2033_v23, %v1919_v3 }
 0x597   : > { %v2035_v44 = vsel %vm3824_vm4, %v2034_v5, %v1923_v34 }
 0x598   : > { %v2036_v8 = vsel %vm3825_vm6, %v2035_v44, %v1927_v30 }
 0x59a   : > { %v1959_v61 = vpop.permute.xlu2 %1958 }
 0x59d   : > { %v1931_v55 = vpop.permute.xlu1 %1930 }
 0x59e   : > { %v2037_v1 = vsel %vm3826_vm7, %v2036_v8, %v1931_v55 }
 0x59f   : > { %v2038_v50 = vsel %vm3827_vm8, %v2037_v1, %v1935_v11 }
 0x5a0   : > { %v2039_v2 = vsel %vm2000_vm13, %v2038_v50, %v1939_v21 }
 0x5a5   : > { %v1943_v13 = vpop.permute.xlu1 %1942 }
 0x5a6   : > { %v2040_v36 = vsel %vm2002_vm11, %v2039_v2, %v1943_v13 }
 0x5a7   : > { %v2041_v52 = vsel %vm2004_vm1, %v2040_v36, %v1947_v42 }
 0x5a8   : > { %v2042_v49 = vsel %vm2006_vm10, %v2041_v52, %v1951_v59 }
 0x5ad   : > { %v1955_v29 = vpop.permute.xlu1 %1954 }
 0x5ae   : > { %v2043_v57 = vsel %vm2008_vm0, %v2042_v49, %v1955_v29  ;;  %vm3828_vm0 = vcmask 1043456  }
 0x5af   : > { %v2044_v16 = vsel %vm2010_vm12, %v2043_v57, %v1959_v61 }
 0x5b0   : > { %v2045_v35 = vsel %vm2012_vm14, %v2044_v16, %v1963_v9 }
 0x5b5   : > { %v1967_v27 = vpop.permute.xlu1 %1966 }
 0x5b6   : > { %v2046_v47 = vsel %vm2014_vm15, %v2045_v35, %v1967_v27 }
 0x5b7   : > { %v2049_v25 = vrot.slane %v2046_v47, 4 }
 0x5b9   : > { %v2050_v39 = vsel %vm3828_vm0, %v3700_v43, %v2049_v25 }
 0x5ba   : > { %2052 = vst [vmem:[%s154_s24] sm:$0xff] %v2050_v39 }
 0x5bb   : > { %2328 = shalt.err (!%p2325_p13)
}
 0x5bc   : > { %2175 = dma.vmem_to_hbm [thread:$0]  (%p2481_p9), %s2070_s27, 128, %s2072_s30, %s2054_s9  }
 0x5bd PF: > { %s2083_s5 = sand.u32 1, %s2363_s6   ;;  %p2182_p0 = pnand %p2159_p12, %p2488_p11 }
 0x5be   : > { %s2084_s26 = scalar_lea.sflag [#allocation4], %s2083_s5 }
 0x5bf   : > { %p2183_p1 = pneg %p2182_p0 }
 0x5c1   : > { %2358 = dma.done.wait (%p2183_p1), %s2084_s26, 128  }
 0x5c2   : > { %2360 = vsyncadd (%p2183_p1), %s2084_s26, 4294967168  ;;  %s17_s11 = sadd.s32 1, %s2383_s11   ;;  %s3829_s6 = smov %s2367_s7 }
 0x5c3   : > { %p14_p2 = scmp.ge.s32.totalorder %s17_s11, 4   ;;  %s3830_s7 = smov %s2371_s8 }
 0x5c4   : > { %s3831_s8 = smov %s2486_s20  ;;  %s3832_s9 = smov %s2379_s10 }
 0x5c5   : > { %s3833_s10 = smov %s3835_s14  ;;  %16 = sbr.rel (!%p14_p2) target bundleno = 6 (0x6), region = 69 }
 0x5ca   :  { %2090 = vsyncpa [#allocation3], 1 }
 0x5cb   :  { %2092 = vsyncpa [#allocation3 + $0x1], 1 }
 0x5cc   :  { %2093 = vsyncpa [#allocation4], 1 }
 0x5cd   :  { %2095 = vsyncpa [#allocation4 + $0x1], 1 }

</bundles_post_ra>
